<compile_context>
chip_gen: v7x
topology: tpu7x:2x2x1
jax: 0.10.0
libtpu: 0.0.40
codegen_flags: <defaults>
</compile_context>

<pallas_src>
import numpy as np
import jax
import jax.numpy as jnp
from jax import lax
from jax.experimental import pallas as pl
from jax.experimental.pallas import tpu as pltpu

NUM_LANDMARKS = 468
LM_FLAT = NUM_LANDMARKS * 3          # 1404
FEATURE_DIM = 512
NUM_CLASSES = 2
POSE_DIM = 6
LF_DIM = 64
PACK_W = 128                         # lane-dense packed aux-output width

# landmark indices used by estimate_head_pose
_NOSE, _LEYE, _REYE, _LMOUTH, _RMOUTH, _CHIN = 1, 33, 263, 61, 291, 18


# ---------------------------------------------------------------------------
# Pallas kernel: one batch tile of the full forward pass
# ---------------------------------------------------------------------------
def _geometry_kernel(lm_ref,
                     w1_ref, b1_ref, w2_ref, b2_ref, w3_ref, b3_ref,
                     wf_ref, bf_ref, wc_ref, bc_ref,
                     packed_ref, feat_ref):
    lm = lm_ref[...]                                            # (TB, 1404)

    # ---- head pose: static lane slices + a handful of VPU adds -------------
    def col(c):                                                 # (TB, 1)
        return lm[:, c:c + 1]

    nx, ny, nz = col(3 * _NOSE), col(3 * _NOSE + 1), col(3 * _NOSE + 2)
    lex, ley, lez = col(3 * _LEYE), col(3 * _LEYE + 1), col(3 * _LEYE + 2)
    rex, rey, rez = col(3 * _REYE), col(3 * _REYE + 1), col(3 * _REYE + 2)
    lmx = col(3 * _LMOUTH)
    rmx = col(3 * _RMOUTH)
    chy = col(3 * _CHIN + 1)

    pose = jnp.concatenate([nx - 0.5 * (lex + rex),
                            ny - 0.5 * (ley + rey),
                            nz - 0.5 * (lez + rez),
                            rex - lex,
                            rmx - lmx,
                            chy - ny], axis=-1)                 # (TB, 6)

    # ---- pose_estimator MLP 1404 -> 256 -> 128 -> 64 (Dropout = identity) --
    h1 = jnp.dot(lm, w1_ref[...], preferred_element_type=jnp.float32) + b1_ref[...]
    h1 = jnp.maximum(h1, 0.0)
    h2 = jnp.dot(h1, w2_ref[...], preferred_element_type=jnp.float32) + b2_ref[...]
    h2 = jnp.maximum(h2, 0.0)
    lf = jnp.dot(h2, w3_ref[...], preferred_element_type=jnp.float32) + b3_ref[...]

    # ---- fusion on concat([lf, pose]) as ONE MXU matmul (70 x 512 weight) --
    combined = jnp.concatenate([lf, pose], axis=-1)             # (TB, 70)
    feat = jnp.dot(combined, wf_ref[...],
                   preferred_element_type=jnp.float32) + bf_ref[...]
    feat = jnp.maximum(feat, 0.0)                               # ReLU (Dropout = identity)

    # ---- classifier 512 -> num_classes --------------------------------------
    out = jnp.dot(feat, wc_ref[...], preferred_element_type=jnp.float32) + bc_ref[...]

    # ---- stores: features (512 lanes) + one lane-dense packed (TB,128) slab -
    feat_ref[...] = feat
    pad = jnp.zeros((feat.shape[0], PACK_W - NUM_CLASSES - POSE_DIM - LF_DIM),
                    jnp.float32)
    packed_ref[...] = jnp.concatenate([out, pose, lf, pad], axis=-1)


def _round_up(x, m):
    return (x + m - 1) // m * m


def _choose_tile(batch):
    """Pick (TB, B_pad, n_steps): >=4 grid steps when possible, TB <= 512."""
    rows = _round_up(max(int(batch), 1), 8)
    if rows <= 4 * 512:
        n_tiles = max(1, min(4, rows // 8))
    else:
        n_tiles = pl.cdiv(rows, 512)
    tb = _round_up(pl.cdiv(rows, n_tiles), 8)
    b_pad = tb * n_tiles
    return tb, b_pad, n_tiles


def geometry3d_analyzer_forward(landmarks, params):
    """landmarks: (B, 468, 3) float32.  Returns dict matching the PyTorch module."""
    B = landmarks.shape[0]
    lm_flat = landmarks.reshape(B, LM_FLAT).astype(jnp.float32)

    TB, B_pad, n_steps = _choose_tile(B)
    if B_pad != B:
        lm_in = jnp.pad(lm_flat, ((0, B_pad - B), (0, 0)))      # single fused pad
    else:
        lm_in = lm_flat

    weights = (params["w1"], params["b1"], params["w2"], params["b2"],
               params["w3"], params["b3"],
               params["wf"], params["bf"],
               params["wc"], params["bc"])

    flops = 2 * B_pad * (LM_FLAT * 256 + 256 * 128 + 128 * LF_DIM
                         + (LF_DIM + POSE_DIM) * FEATURE_DIM
                         + FEATURE_DIM * NUM_CLASSES)
    weight_bytes = sum(int(np.prod(w.shape)) * 4 for w in weights)
    bytes_accessed = (B_pad * LM_FLAT * 4 + weight_bytes
                      + B_pad * (PACK_W + FEATURE_DIM) * 4)

    packed, features = pl.pallas_call(
        _geometry_kernel,
        out_shape=(jax.ShapeDtypeStruct((B_pad, PACK_W), jnp.float32),
                   jax.ShapeDtypeStruct((B_pad, FEATURE_DIM), jnp.float32)),
        grid=(n_steps,),
        in_specs=[pl.BlockSpec((TB, LM_FLAT), lambda i: (i, 0))]
                 + [pl.BlockSpec(w.shape, lambda i: (0, 0)) for w in weights],
        out_specs=(pl.BlockSpec((TB, PACK_W), lambda i: (i, 0)),
                   pl.BlockSpec((TB, FEATURE_DIM), lambda i: (i, 0))),
        compiler_params=pltpu.CompilerParams(
            dimension_semantics=("parallel",),
            vmem_limit_bytes=48 << 20),
        cost_estimate=pl.CostEstimate(flops=flops, transcendentals=0,
                                      bytes_accessed=bytes_accessed),
    )(lm_in, *weights)

    return {
        "output": packed[:B, 0:NUM_CLASSES],
        "features": features[:B],
        "pose_features": packed[:B, NUM_CLASSES:NUM_CLASSES + POSE_DIM],
        "landmark_features": packed[:B, NUM_CLASSES + POSE_DIM:
                                    NUM_CLASSES + POSE_DIM + LF_DIM],
    }


# ---------------------------------------------------------------------------
# Deterministic parameter construction (PyTorch-style Linear init shapes)
# ---------------------------------------------------------------------------
def _init_linear(key, fan_in, fan_out):
    kw, kb = jax.random.split(key)
    bound = 1.0 / np.sqrt(fan_in)
    w = jax.random.uniform(kw, (fan_in, fan_out), jnp.float32, -bound, bound)
    b = jax.random.uniform(kb, (1, fan_out), jnp.float32, -bound, bound)
    return w, b


def make_params(key):
    keys = jax.random.split(key, 5)
    w1, b1 = _init_linear(keys[0], LM_FLAT, 256)
    w2, b2 = _init_linear(keys[1], 256, 128)
    w3, b3 = _init_linear(keys[2], 128, LF_DIM)
    wf, bf = _init_linear(keys[3], LF_DIM + POSE_DIM, FEATURE_DIM)   # combined (70, 512)
    wc, bc = _init_linear(keys[4], FEATURE_DIM, NUM_CLASSES)
    return {"w1": w1, "b1": b1, "w2": w2, "b2": b2, "w3": w3, "b3": b3,
            "wf": wf, "bf": bf, "wc": wc, "bc": bc}


# ---------------------------------------------------------------------------
# Pure-JAX reference (mirrors the PyTorch forward, eval mode)
# ---------------------------------------------------------------------------
def reference_forward(landmarks, params):
    hp = lax.Precision.HIGHEST
    B = landmarks.shape[0]
    lm_flat = landmarks.reshape(B, LM_FLAT)
    l3 = landmarks.reshape(B, NUM_LANDMARKS, 3)
    nose, le, re = l3[:, _NOSE], l3[:, _LEYE], l3[:, _REYE]
    lmo, rmo, chin = l3[:, _LMOUTH], l3[:, _RMOUTH], l3[:, _CHIN]
    pose = jnp.stack([
        nose[:, 0] - (le[:, 0] + re[:, 0]) / 2,
        nose[:, 1] - (le[:, 1] + re[:, 1]) / 2,
        nose[:, 2] - (le[:, 2] + re[:, 2]) / 2,
        re[:, 0] - le[:, 0],
        rmo[:, 0] - lmo[:, 0],
        chin[:, 1] - nose[:, 1],
    ], axis=1)
    h1 = jax.nn.relu(jnp.dot(lm_flat, params["w1"], precision=hp) + params["b1"])
    h2 = jax.nn.relu(jnp.dot(h1, params["w2"], precision=hp) + params["b2"])
    lf = jnp.dot(h2, params["w3"], precision=hp) + params["b3"]
    combined = jnp.concatenate([lf, pose], axis=-1)
    feat = jax.nn.relu(jnp.dot(combined, params["wf"], precision=hp) + params["bf"])
    out = jnp.dot(feat, params["wc"], precision=hp) + params["bc"]
    return {"output": out, "features": feat, "pose_features": pose,
            "landmark_features": lf}


if __name__ == "__main__":
    key = jax.random.PRNGKey(0)
    k_param, k_data = jax.random.split(key)

    params = make_params(k_param)
    B = 2
    landmarks = jax.random.normal(k_data, (B, NUM_LANDMARKS, 3), jnp.float32)

    result = geometry3d_analyzer_forward(landmarks, params)
    jax.block_until_ready(result)

    ref = reference_forward(landmarks, params)
    for name in ("output", "features", "pose_features", "landmark_features"):
        np.testing.assert_allclose(np.asarray(result[name]), np.asarray(ref[name]),
                                   rtol=1e-3, atol=1e-3)

    print("KERNEL_OK")
</pallas_src>

<mosaic_0001>
module attributes {stable_mosaic.version = 11 : i64} {
  func.func @_geometry_kernel(%arg0: i32, %arg1: memref<8x1404xf32, #tpu.memory_space<vmem>>, %arg2: memref<1404x256xf32, #tpu.memory_space<vmem>>, %arg3: memref<1x256xf32, #tpu.memory_space<vmem>>, %arg4: memref<256x128xf32, #tpu.memory_space<vmem>>, %arg5: memref<1x128xf32, #tpu.memory_space<vmem>>, %arg6: memref<128x64xf32, #tpu.memory_space<vmem>>, %arg7: memref<1x64xf32, #tpu.memory_space<vmem>>, %arg8: memref<70x512xf32, #tpu.memory_space<vmem>>, %arg9: memref<1x512xf32, #tpu.memory_space<vmem>>, %arg10: memref<512x2xf32, #tpu.memory_space<vmem>>, %arg11: memref<1x2xf32, #tpu.memory_space<vmem>>, %arg12: memref<8x128xf32, #tpu.memory_space<vmem>>, %arg13: memref<8x512xf32, #tpu.memory_space<vmem>>) attributes {dimension_semantics = [#tpu.dimension_semantics<parallel>], iteration_bounds = array<i64: 1>, scalar_prefetch = 0 : i64, scratch_operands = 0 : i64, tpu.core_type = #tpu.core_type<tc>, window_params = [{transform_indices = @transform_0, window_bounds = array<i64: 8, 1404>}, {pipeline_mode = #tpu.pipeline_mode<synchronous>, transform_indices = @transform_1, window_bounds = array<i64: 1404, 256>}, {pipeline_mode = #tpu.pipeline_mode<synchronous>, transform_indices = @transform_2, window_bounds = array<i64: 1, 256>}, {pipeline_mode = #tpu.pipeline_mode<synchronous>, transform_indices = @transform_3, window_bounds = array<i64: 256, 128>}, {pipeline_mode = #tpu.pipeline_mode<synchronous>, transform_indices = @transform_4, window_bounds = array<i64: 1, 128>}, {pipeline_mode = #tpu.pipeline_mode<synchronous>, transform_indices = @transform_5, window_bounds = array<i64: 128, 64>}, {pipeline_mode = #tpu.pipeline_mode<synchronous>, transform_indices = @transform_6, window_bounds = array<i64: 1, 64>}, {pipeline_mode = #tpu.pipeline_mode<synchronous>, transform_indices = @transform_7, window_bounds = array<i64: 70, 512>}, {pipeline_mode = #tpu.pipeline_mode<synchronous>, transform_indices = @transform_8, window_bounds = array<i64: 1, 512>}, {pipeline_mode = #tpu.pipeline_mode<synchronous>, transform_indices = @transform_9, window_bounds = array<i64: 512, 2>}, {pipeline_mode = #tpu.pipeline_mode<synchronous>, transform_indices = @transform_10, window_bounds = array<i64: 1, 2>}, {transform_indices = @transform_11, window_bounds = array<i64: 8, 128>}, {transform_indices = @transform_12, window_bounds = array<i64: 8, 512>}]} {
    %c0 = arith.constant 0 : index
    %c0_0 = arith.constant 0 : index
    %0 = vector.load %arg1[%c0, %c0_0] : memref<8x1404xf32, #tpu.memory_space<vmem>>, vector<8x1404xf32>
    %1 = vector.extract_strided_slice %0 {offsets = [0, 3], sizes = [8, 1], strides = [1, 1]} : vector<8x1404xf32> to vector<8x1xf32>
    %2 = vector.extract_strided_slice %0 {offsets = [0, 4], sizes = [8, 1], strides = [1, 1]} : vector<8x1404xf32> to vector<8x1xf32>
    %3 = vector.extract_strided_slice %0 {offsets = [0, 5], sizes = [8, 1], strides = [1, 1]} : vector<8x1404xf32> to vector<8x1xf32>
    %4 = vector.extract_strided_slice %0 {offsets = [0, 99], sizes = [8, 1], strides = [1, 1]} : vector<8x1404xf32> to vector<8x1xf32>
    %5 = vector.extract_strided_slice %0 {offsets = [0, 100], sizes = [8, 1], strides = [1, 1]} : vector<8x1404xf32> to vector<8x1xf32>
    %6 = vector.extract_strided_slice %0 {offsets = [0, 101], sizes = [8, 1], strides = [1, 1]} : vector<8x1404xf32> to vector<8x1xf32>
    %7 = vector.extract_strided_slice %0 {offsets = [0, 789], sizes = [8, 1], strides = [1, 1]} : vector<8x1404xf32> to vector<8x1xf32>
    %8 = vector.extract_strided_slice %0 {offsets = [0, 790], sizes = [8, 1], strides = [1, 1]} : vector<8x1404xf32> to vector<8x1xf32>
    %9 = vector.extract_strided_slice %0 {offsets = [0, 791], sizes = [8, 1], strides = [1, 1]} : vector<8x1404xf32> to vector<8x1xf32>
    %10 = vector.extract_strided_slice %0 {offsets = [0, 183], sizes = [8, 1], strides = [1, 1]} : vector<8x1404xf32> to vector<8x1xf32>
    %11 = vector.extract_strided_slice %0 {offsets = [0, 873], sizes = [8, 1], strides = [1, 1]} : vector<8x1404xf32> to vector<8x1xf32>
    %12 = vector.extract_strided_slice %0 {offsets = [0, 55], sizes = [8, 1], strides = [1, 1]} : vector<8x1404xf32> to vector<8x1xf32>
    %13 = arith.addf %4, %7 : vector<8x1xf32>
    %cst = arith.constant 5.000000e-01 : f32
    %14 = vector.broadcast %cst : f32 to vector<8x1xf32>
    %15 = arith.mulf %14, %13 : vector<8x1xf32>
    %16 = arith.subf %1, %15 : vector<8x1xf32>
    %17 = arith.addf %5, %8 : vector<8x1xf32>
    %cst_1 = arith.constant 5.000000e-01 : f32
    %18 = vector.broadcast %cst_1 : f32 to vector<8x1xf32>
    %19 = arith.mulf %18, %17 : vector<8x1xf32>
    %20 = arith.subf %2, %19 : vector<8x1xf32>
    %21 = arith.addf %6, %9 : vector<8x1xf32>
    %cst_2 = arith.constant 5.000000e-01 : f32
    %22 = vector.broadcast %cst_2 : f32 to vector<8x1xf32>
    %23 = arith.mulf %22, %21 : vector<8x1xf32>
    %24 = arith.subf %3, %23 : vector<8x1xf32>
    %25 = arith.subf %7, %4 : vector<8x1xf32>
    %26 = arith.subf %11, %10 : vector<8x1xf32>
    %27 = arith.subf %12, %2 : vector<8x1xf32>
    %28 = tpu.concatenate %16, %20, %24, %25, %26, %27 in 1 : vector<8x1xf32>, vector<8x1xf32>, vector<8x1xf32>, vector<8x1xf32>, vector<8x1xf32>, vector<8x1xf32> -> vector<8x6xf32>
    %c0_3 = arith.constant 0 : index
    %c0_4 = arith.constant 0 : index
    %29 = vector.load %arg2[%c0_3, %c0_4] : memref<1404x256xf32, #tpu.memory_space<vmem>>, vector<1404x256xf32>
    %cst_5 = arith.constant dense<0.000000e+00> : vector<8x256xf32>
    %30 = tpu.matmul %0, %29, %cst_5 {dimension_numbers = #tpu.dot_dimension_numbers<[1], [0], [0], [1], [0, 0, 1, 1], [], []>} : vector<8x1404xf32>, vector<1404x256xf32>, vector<8x256xf32> -> vector<8x256xf32>
    %c0_6 = arith.constant 0 : index
    %c0_7 = arith.constant 0 : index
    %31 = vector.load %arg3[%c0_6, %c0_7] : memref<1x256xf32, #tpu.memory_space<vmem>>, vector<1x256xf32>
    %32 = vector.broadcast %31 : vector<1x256xf32> to vector<8x256xf32>
    %33 = arith.addf %30, %32 : vector<8x256xf32>
    %cst_8 = arith.constant 0.000000e+00 : f32
    %34 = vector.broadcast %cst_8 : f32 to vector<8x256xf32>
    %35 = arith.maximumf %33, %34 : vector<8x256xf32>
    %c0_9 = arith.constant 0 : index
    %c0_10 = arith.constant 0 : index
    %36 = vector.load %arg4[%c0_9, %c0_10] : memref<256x128xf32, #tpu.memory_space<vmem>>, vector<256x128xf32>
    %cst_11 = arith.constant dense<0.000000e+00> : vector<8x128xf32>
    %37 = tpu.matmul %35, %36, %cst_11 {dimension_numbers = #tpu.dot_dimension_numbers<[1], [0], [0], [1], [0, 0, 1, 1], [], []>} : vector<8x256xf32>, vector<256x128xf32>, vector<8x128xf32> -> vector<8x128xf32>
    %c0_12 = arith.constant 0 : index
    %c0_13 = arith.constant 0 : index
    %38 = vector.load %arg5[%c0_12, %c0_13] : memref<1x128xf32, #tpu.memory_space<vmem>>, vector<1x128xf32>
    %39 = vector.broadcast %38 : vector<1x128xf32> to vector<8x128xf32>
    %40 = arith.addf %37, %39 : vector<8x128xf32>
    %cst_14 = arith.constant 0.000000e+00 : f32
    %41 = vector.broadcast %cst_14 : f32 to vector<8x128xf32>
    %42 = arith.maximumf %40, %41 : vector<8x128xf32>
    %c0_15 = arith.constant 0 : index
    %c0_16 = arith.constant 0 : index
    %43 = vector.load %arg6[%c0_15, %c0_16] : memref<128x64xf32, #tpu.memory_space<vmem>>, vector<128x64xf32>
    %cst_17 = arith.constant dense<0.000000e+00> : vector<8x64xf32>
    %44 = tpu.matmul %42, %43, %cst_17 {dimension_numbers = #tpu.dot_dimension_numbers<[1], [0], [0], [1], [0, 0, 1, 1], [], []>} : vector<8x128xf32>, vector<128x64xf32>, vector<8x64xf32> -> vector<8x64xf32>
    %c0_18 = arith.constant 0 : index
    %c0_19 = arith.constant 0 : index
    %45 = vector.load %arg7[%c0_18, %c0_19] : memref<1x64xf32, #tpu.memory_space<vmem>>, vector<1x64xf32>
    %46 = vector.broadcast %45 : vector<1x64xf32> to vector<8x64xf32>
    %47 = arith.addf %44, %46 : vector<8x64xf32>
    %48 = tpu.concatenate %47, %28 in 1 : vector<8x64xf32>, vector<8x6xf32> -> vector<8x70xf32>
    %c0_20 = arith.constant 0 : index
    %c0_21 = arith.constant 0 : index
    %49 = vector.load %arg8[%c0_20, %c0_21] : memref<70x512xf32, #tpu.memory_space<vmem>>, vector<70x512xf32>
    %cst_22 = arith.constant dense<0.000000e+00> : vector<8x512xf32>
    %50 = tpu.matmul %48, %49, %cst_22 {dimension_numbers = #tpu.dot_dimension_numbers<[1], [0], [0], [1], [0, 0, 1, 1], [], []>} : vector<8x70xf32>, vector<70x512xf32>, vector<8x512xf32> -> vector<8x512xf32>
    %c0_23 = arith.constant 0 : index
    %c0_24 = arith.constant 0 : index
    %51 = vector.load %arg9[%c0_23, %c0_24] : memref<1x512xf32, #tpu.memory_space<vmem>>, vector<1x512xf32>
    %52 = vector.broadcast %51 : vector<1x512xf32> to vector<8x512xf32>
    %53 = arith.addf %50, %52 : vector<8x512xf32>
    %cst_25 = arith.constant 0.000000e+00 : f32
    %54 = vector.broadcast %cst_25 : f32 to vector<8x512xf32>
    %55 = arith.maximumf %53, %54 : vector<8x512xf32>
    %c0_26 = arith.constant 0 : index
    %c0_27 = arith.constant 0 : index
    %56 = vector.load %arg10[%c0_26, %c0_27] : memref<512x2xf32, #tpu.memory_space<vmem>>, vector<512x2xf32>
    %cst_28 = arith.constant dense<0.000000e+00> : vector<8x2xf32>
    %57 = tpu.matmul %55, %56, %cst_28 {dimension_numbers = #tpu.dot_dimension_numbers<[1], [0], [0], [1], [0, 0, 1, 1], [], []>} : vector<8x512xf32>, vector<512x2xf32>, vector<8x2xf32> -> vector<8x2xf32>
    %c0_29 = arith.constant 0 : index
    %c0_30 = arith.constant 0 : index
    %58 = vector.load %arg11[%c0_29, %c0_30] : memref<1x2xf32, #tpu.memory_space<vmem>>, vector<1x2xf32>
    %59 = vector.broadcast %58 : vector<1x2xf32> to vector<8x2xf32>
    %60 = arith.addf %57, %59 : vector<8x2xf32>
    %c0_31 = arith.constant 0 : index
    %c0_32 = arith.constant 0 : index
    %61 = vector.load %arg13[%c0_31, %c0_32] : memref<8x512xf32, #tpu.memory_space<vmem>>, vector<8x512xf32>
    tpu.vector_store %arg13[%c0_31, %c0_32], %55 {strides = array<i32>} : memref<8x512xf32, #tpu.memory_space<vmem>>, vector<8x512xf32>,
    %cst_33 = arith.constant 0.000000e+00 : f32
    %62 = vector.broadcast %cst_33 : f32 to vector<8x56xf32>
    %63 = tpu.concatenate %60, %28, %47, %62 in 1 : vector<8x2xf32>, vector<8x6xf32>, vector<8x64xf32>, vector<8x56xf32> -> vector<8x128xf32>
    %c0_34 = arith.constant 0 : index
    %c0_35 = arith.constant 0 : index
    %64 = vector.load %arg12[%c0_34, %c0_35] : memref<8x128xf32, #tpu.memory_space<vmem>>, vector<8x128xf32>
    tpu.vector_store %arg12[%c0_34, %c0_35], %63 {strides = array<i32>} : memref<8x128xf32, #tpu.memory_space<vmem>>, vector<8x128xf32>,
    return
  }
  func.func @transform_0(%arg0: i32) -> (i32, i32) {
    %c0_i32 = arith.constant 0 : i32
    %c0_i32_0 = arith.constant 0 : i32
    return %arg0, %c0_i32 : i32, i32
  }
  func.func @transform_1(%arg0: i32) -> (i32, i32) {
    %c0_i32 = arith.constant 0 : i32
    %c0_i32_0 = arith.constant 0 : i32
    %c0_i32_1 = arith.constant 0 : i32
    return %c0_i32, %c0_i32_0 : i32, i32
  }
  func.func @transform_2(%arg0: i32) -> (i32, i32) {
    %c0_i32 = arith.constant 0 : i32
    %c0_i32_0 = arith.constant 0 : i32
    %c0_i32_1 = arith.constant 0 : i32
    return %c0_i32, %c0_i32_0 : i32, i32
  }
  func.func @transform_3(%arg0: i32) -> (i32, i32) {
    %c0_i32 = arith.constant 0 : i32
    %c0_i32_0 = arith.constant 0 : i32
    %c0_i32_1 = arith.constant 0 : i32
    return %c0_i32, %c0_i32_0 : i32, i32
  }
  func.func @transform_4(%arg0: i32) -> (i32, i32) {
    %c0_i32 = arith.constant 0 : i32
    %c0_i32_0 = arith.constant 0 : i32
    %c0_i32_1 = arith.constant 0 : i32
    return %c0_i32, %c0_i32_0 : i32, i32
  }
  func.func @transform_5(%arg0: i32) -> (i32, i32) {
    %c0_i32 = arith.constant 0 : i32
    %c0_i32_0 = arith.constant 0 : i32
    %c0_i32_1 = arith.constant 0 : i32
    return %c0_i32, %c0_i32_0 : i32, i32
  }
  func.func @transform_6(%arg0: i32) -> (i32, i32) {
    %c0_i32 = arith.constant 0 : i32
    %c0_i32_0 = arith.constant 0 : i32
    %c0_i32_1 = arith.constant 0 : i32
    return %c0_i32, %c0_i32_0 : i32, i32
  }
  func.func @transform_7(%arg0: i32) -> (i32, i32) {
    %c0_i32 = arith.constant 0 : i32
    %c0_i32_0 = arith.constant 0 : i32
    %c0_i32_1 = arith.constant 0 : i32
    return %c0_i32, %c0_i32_0 : i32, i32
  }
  func.func @transform_8(%arg0: i32) -> (i32, i32) {
    %c0_i32 = arith.constant 0 : i32
    %c0_i32_0 = arith.constant 0 : i32
    %c0_i32_1 = arith.constant 0 : i32
    return %c0_i32, %c0_i32_0 : i32, i32
  }
  func.func @transform_9(%arg0: i32) -> (i32, i32) {
    %c0_i32 = arith.constant 0 : i32
    %c0_i32_0 = arith.constant 0 : i32
    %c0_i32_1 = arith.constant 0 : i32
    return %c0_i32, %c0_i32_0 : i32, i32
  }
  func.func @transform_10(%arg0: i32) -> (i32, i32) {
    %c0_i32 = arith.constant 0 : i32
    %c0_i32_0 = arith.constant 0 : i32
    %c0_i32_1 = arith.constant 0 : i32
    return %c0_i32, %c0_i32_0 : i32, i32
  }
  func.func @transform_11(%arg0: i32) -> (i32, i32) {
    %c0_i32 = arith.constant 0 : i32
    %c0_i32_0 = arith.constant 0 : i32
    return %arg0, %c0_i32 : i32, i32
  }
  func.func @transform_12(%arg0: i32) -> (i32, i32) {
    %c0_i32 = arith.constant 0 : i32
    %c0_i32_0 = arith.constant 0 : i32
    return %arg0, %c0_i32 : i32, i32
  }
}

</mosaic_0001>

<bundles_post_ra>
// kernel: tpu_custom_call.1
= control target key start
LH: loop header
LB: loop body
LE: loop exit
PB: predicated region body
PF: predicated region fallthrough
CT: control target
= control target key end

     0   :  { %18 = vsyncpa [#allocation3], 0  ;;  %s3215_s0 = inlined_call_operand.hbm [shape: f32[8,1404], index: 0, kind: input, shape index: {}]   ;;  %s3216_s1 = inlined_call_operand.hbm [shape: f32[1404,256], index: 1, kind: input, shape index: {}]   ;;  %s3217_s2 = inlined_call_operand.hbm [shape: f32[1,256], index: 2, kind: input, shape index: {}]   ;;  %s3218_s3 = inlined_call_operand.hbm [shape: f32[256,128], index: 3, kind: input, shape index: {}]   ;;  %s3219_s4 = inlined_call_operand.hbm [shape: f32[1,128], index: 4, kind: input, shape index: {}]   ;;  %s3220_s5 = inlined_call_operand.vmem [shape: f32[128,64], index: 5, kind: input, shape index: {}]   ;;  %s3221_s6 = inlined_call_operand.hbm [shape: f32[1,64], index: 6, kind: input, shape index: {}]   ;;  %s3222_s7 = inlined_call_operand.hbm [shape: f32[70,512], index: 7, kind: input, shape index: {}]   ;;  %s3223_s8 = inlined_call_operand.hbm [shape: f32[1,512], index: 8, kind: input, shape index: {}]   ;;  %s3224_s9 = inlined_call_operand.vmem [shape: f32[512,2], index: 9, kind: input, shape index: {}]   ;;  %s3225_s10 = inlined_call_operand.hbm [shape: f32[1,2], index: 10, kind: input, shape index: {}]   ;;  %s3226_s11 = inlined_call_operand.hbm [shape: f32[8,128], index: 11, kind: output, shape index: {0}]   ;;  %s3227_s12 = inlined_call_operand.hbm [shape: f32[8,512], index: 12, kind: output, shape index: {1}]  }
   0x1   :  { %19 = vsyncpa [#allocation6], 0 }
   0x2   :  { %20 = vsyncpa [#allocation9], 0 }
   0x3   :  { %21 = vsyncpa [#allocation12], 0 }
   0x4   :  { %22 = vsyncpa [#allocation15], 0 }
   0x5   :  { %23 = vsyncpa [#allocation4], 0 }
   0x6   :  { %24 = vsyncpa [#allocation19], 0  ;;  %s2678_s21 = smov [#allocation5]   ;;  %s2422_s25 = scalar_lea.hbm %s3216_s1, 45056 }
   0x7   :  { %s40_s22 = sshll.u32 %s2678_s21, 4  ;;  %p2423_p0 = scmp.ne.s32.totalorder %s3216_s1, %s2422_s25  ;;  %s41_s22 = int_to_ptr.vmem [resolvable:$true] %s40_s22 }
   0x8   :  { %p2426_p1 = scmp.lt.u32.totalorder %s2422_s25, %s3216_s1 }
   0xa   :  { %p2428_p2 = pnand %p2426_p1, %p2423_p0 }
   0xc   :  { %2431 = shalt.err (!%p2428_p2)
}
   0xd   :  { %s2432_s30 = scalar_lea.vmem %s41_s22, 45056  ;;  %p2437_p4 = scmp.lt.s32.totalorder %s41_s22, %s41_s22 }
   0xe   :  { %p2433_p3 = scmp.ne.s32.totalorder %s41_s22, %s2432_s30  ;;  %p2438_p5 = scmp.lt.s32.totalorder %s2432_s30, %s2432_s30 }
  0x10   :  { %p2439_p6 = por %p2438_p5, %p2437_p4 }
  0x12   :  { %p2440_p7 = pnand %p2439_p6, %p2433_p3 }
  0x14   :  { %2443 = shalt.err (!%p2440_p7)
}
  0x15   :  { %s2679_s13 = smov 256   ;;  %s2680_s14 = smov 16  }
  0x16   :  { %46 = dma.hbm_to_vmem [thread:$0]  %s3216_s1, 45056, %s41_s22, [#allocation6], %s2679_s13, %s2679_s13, %s2680_s14  }
  0x17   :  { %s2681_s17 = smov [#allocation8]   ;;  %s2444_s21 = scalar_lea.hbm %s3218_s3, 4096 }
  0x18   :  { %s62_s18 = sshll.u32 %s2681_s17, 4  ;;  %p2445_p8 = scmp.ne.s32.totalorder %s3218_s3, %s2444_s21  ;;  %s63_s18 = int_to_ptr.vmem [resolvable:$true] %s62_s18 }
  0x19   :  { %p2448_p9 = scmp.lt.u32.totalorder %s2444_s21, %s3218_s3 }
  0x1b   :  { %p2450_p10 = pnand %p2448_p9, %p2445_p8 }
  0x1d   :  { %2453 = shalt.err (!%p2450_p10)
}
  0x1e   :  { %s2454_s27 = scalar_lea.vmem %s63_s18, 4096  ;;  %p2459_p12 = scmp.lt.s32.totalorder %s63_s18, %s63_s18 }
  0x1f   :  { %p2455_p11 = scmp.ne.s32.totalorder %s63_s18, %s2454_s27  ;;  %p2460_p13 = scmp.lt.s32.totalorder %s2454_s27, %s2454_s27 }
  0x21   :  { %p2461_p0 = por %p2460_p13, %p2459_p12 }
  0x23   :  { %p2462_p1 = pnand %p2461_p0, %p2455_p11 }
  0x25   :  { %2465 = shalt.err (!%p2462_p1)
}
  0x26   :  { %s2682_s1 = smov 128   ;;  %s2683_s22 = smov 8  }
  0x27   :  { %68 = dma.hbm_to_vmem [thread:$0]  %s3218_s3, 4096, %s63_s18, [#allocation9], %s2682_s1, %s2682_s1, %s2683_s22  }
  0x28   :  { %s2684_s30 = smov [#allocation11]   ;;  %s2685_s14 = smov [#allocation14]  }
  0x29   :  { %s87_s13 = sshll.u32 %s2684_s30, 4  ;;  %s109_s15 = sshll.u32 %s2685_s14, 4  ;;  %s88_s13 = int_to_ptr.vmem [resolvable:$true] %s87_s13  ;;  %s110_s15 = int_to_ptr.vmem [resolvable:$true] %s109_s15 }
  0x2a   :  { %s2466_s19 = scalar_lea.hbm %s3221_s6, 16 }
  0x2b   :  { %p2467_p2 = scmp.ne.s32.totalorder %s3221_s6, %s2466_s19  ;;  %p2470_p3 = scmp.lt.u32.totalorder %s2466_s19, %s3221_s6 }
  0x2d   :  { %p2472_p4 = pnand %p2470_p3, %p2467_p2 }
  0x2f   :  { %2475 = shalt.err (!%p2472_p4)
}
  0x30   :  { %s2476_s3 = scalar_lea.vmem %s88_s13, 16  ;;  %s2480_s18 = scalar_lea.vmem %s88_s13, 32 }
  0x31   :  { %p2477_p5 = scmp.ne.s32.totalorder %s88_s13, %s2476_s3  ;;  %p2481_p6 = scmp.lt.s32.totalorder %s88_s13, %s88_s13 }
  0x32   :  { %p2482_p7 = scmp.lt.s32.totalorder %s2480_s18, %s2476_s3 }
  0x34   :  { %p2483_p8 = por %p2482_p7, %p2481_p6 }
  0x36   :  { %p2484_p9 = pnand %p2483_p8, %p2477_p5 }
  0x38   :  { %2487 = shalt.err (!%p2484_p9)
}
  0x39   :  { %90 = dma.hbm_to_vmem [thread:$0]  %s3221_s6, 16, %s88_s13, [#allocation12]  }
  0x3a   :  { %s2488_s28 = scalar_lea.hbm %s3223_s8, 64 }
  0x3b   :  { %p2489_p10 = scmp.ne.s32.totalorder %s3223_s8, %s2488_s28  ;;  %p2492_p11 = scmp.lt.u32.totalorder %s2488_s28, %s3223_s8 }
  0x3d   :  { %p2494_p12 = pnand %p2492_p11, %p2489_p10 }
  0x3f   :  { %2497 = shalt.err (!%p2494_p12)
}
  0x40   :  { %s2498_s17 = scalar_lea.vmem %s110_s15, 64  ;;  %p2503_p0 = scmp.lt.s32.totalorder %s110_s15, %s110_s15 }
  0x41   :  { %p2499_p13 = scmp.ne.s32.totalorder %s110_s15, %s2498_s17  ;;  %p2504_p1 = scmp.lt.s32.totalorder %s2498_s17, %s2498_s17 }
  0x43   :  { %p2505_p2 = por %p2504_p1, %p2503_p0 }
  0x45   :  { %p2506_p3 = pnand %p2505_p2, %p2499_p13 }
  0x47   :  { %2509 = shalt.err (!%p2506_p3)
}
  0x48   :  { %112 = dma.hbm_to_vmem [thread:$0]  %s3223_s8, 64, %s110_s15, [#allocation15]  }
  0x49   :  { %s2686_s19 = smov [#allocation2]   ;;  %s2687_s21 = smov [#allocation7]  }
  0x4a   :  { %s31_s20 = sshll.u32 %s2686_s19, 4  ;;  %s53_s23 = sshll.u32 %s2687_s21, 4  ;;  %s32_s20 = int_to_ptr.vmem [resolvable:$true] %s31_s20  ;;  %s54_s23 = int_to_ptr.vmem [resolvable:$true] %s53_s23 }
  0x4b   :  { %s2510_s18 = scalar_lea.hbm %s3215_s0, 1408 }
  0x4c   :  { %p2511_p4 = scmp.ne.s32.totalorder %s3215_s0, %s2510_s18  ;;  %p2514_p5 = scmp.lt.u32.totalorder %s2510_s18, %s3215_s0 }
  0x4e   :  { %p2516_p6 = pnand %p2514_p5, %p2511_p4 }
  0x50   :  { %2519 = shalt.err (!%p2516_p6)
}
  0x51   :  { %s2520_s8 = scalar_lea.vmem %s32_s20, 1408  ;;  %p2525_p8 = scmp.lt.s32.totalorder %s32_s20, %s32_s20 }
  0x52   :  { %p2521_p7 = scmp.ne.s32.totalorder %s32_s20, %s2520_s8  ;;  %p2526_p9 = scmp.lt.s32.totalorder %s2520_s8, %s2520_s8 }
  0x54   :  { %p2527_p10 = por %p2526_p9, %p2525_p8 }
  0x56   :  { %p2528_p11 = pnand %p2527_p10, %p2521_p7 }
  0x58   :  { %2531 = shalt.err (!%p2528_p11)
}
  0x59   :  { %34 = dma.hbm_to_vmem [thread:$0]  %s3215_s0, 1408, %s32_s20, [#allocation3]  }
  0x5a   :  { %s2532_s14 = scalar_lea.hbm %s3217_s2, 32 }
  0x5b   :  { %p2533_p12 = scmp.ne.s32.totalorder %s3217_s2, %s2532_s14  ;;  %p2536_p13 = scmp.lt.u32.totalorder %s2532_s14, %s3217_s2 }
  0x5d   :  { %p2538_p0 = pnand %p2536_p13, %p2533_p12 }
  0x5f   :  { %2541 = shalt.err (!%p2538_p0)
}
  0x60   :  { %s2542_s19 = scalar_lea.vmem %s54_s23, 32  ;;  %p2547_p2 = scmp.lt.s32.totalorder %s54_s23, %s54_s23 }
  0x61   :  { %p2543_p1 = scmp.ne.s32.totalorder %s54_s23, %s2542_s19  ;;  %p2548_p3 = scmp.lt.s32.totalorder %s2542_s19, %s2542_s19 }
  0x63   :  { %p2549_p4 = por %p2548_p3, %p2547_p2 }
  0x65   :  { %p2550_p5 = pnand %p2549_p4, %p2543_p1 }
  0x67   :  { %2553 = shalt.err (!%p2550_p5)
}
  0x68   :  { %56 = dma.hbm_to_vmem [thread:$0]  %s3217_s2, 32, %s54_s23, [#allocation6]  }
  0x69   :  { %s2688_s21 = smov [#allocation10]   ;;  %s2689_s3 = smov [#allocation13]  }
  0x6a   :  { %s75_s24 = sshll.u32 %s2688_s21, 4  ;;  %s96_s18 = sshll.u32 %s2689_s3, 4  ;;  %s76_s24 = int_to_ptr.vmem [resolvable:$true] %s75_s24  ;;  %s2845_s18 = int_to_ptr.vmem [resolvable:$true] %s96_s18 }
  0x6b   :  { %s2554_s27 = scalar_lea.hbm %s3219_s4, 16 }
  0x6c   :  { %p2555_p6 = scmp.ne.s32.totalorder %s3219_s4, %s2554_s27  ;;  %p2558_p7 = scmp.lt.u32.totalorder %s2554_s27, %s3219_s4 }
  0x6e   :  { %p2560_p8 = pnand %p2558_p7, %p2555_p6 }
  0x70   :  { %2563 = shalt.err (!%p2560_p8)
}
  0x71   :  { %s2564_s2 = scalar_lea.vmem %s76_s24, 16  ;;  %s2568_s23 = scalar_lea.vmem %s76_s24, 32 }
  0x72   :  { %p2565_p9 = scmp.ne.s32.totalorder %s76_s24, %s2564_s2  ;;  %p2569_p10 = scmp.lt.s32.totalorder %s76_s24, %s76_s24 }
  0x73   :  { %p2570_p11 = scmp.lt.s32.totalorder %s2568_s23, %s2564_s2 }
  0x75   :  { %p2571_p12 = por %p2570_p11, %p2569_p10 }
  0x77   :  { %p2572_p13 = pnand %p2571_p12, %p2565_p9 }
  0x79   :  { %2575 = shalt.err (!%p2572_p13)
}
  0x7a   :  { %78 = dma.hbm_to_vmem [thread:$0]  %s3219_s4, 16, %s76_s24, [#allocation9]  }
  0x7b   :  { %s2576_s17 = scalar_lea.hbm %s3222_s7, 4608 }
  0x7c   :  { %p2577_p0 = scmp.ne.s32.totalorder %s3222_s7, %s2576_s17  ;;  %p2580_p1 = scmp.lt.u32.totalorder %s2576_s17, %s3222_s7 }
  0x7e   :  { %p2582_p2 = pnand %p2580_p1, %p2577_p0 }
  0x80   :  { %2585 = shalt.err (!%p2582_p2)
}
  0x81   :  { %s2586_s20 = scalar_lea.vmem %s2845_s18, 4608  ;;  %p2591_p4 = scmp.lt.s32.totalorder %s2845_s18, %s2845_s18 }
  0x82   :  { %p2587_p3 = scmp.ne.s32.totalorder %s2845_s18, %s2586_s20  ;;  %p2592_p5 = scmp.lt.s32.totalorder %s2586_s20, %s2586_s20 }
  0x84   :  { %p2593_p6 = por %p2592_p5, %p2591_p4 }
  0x86   :  { %p2594_p7 = pnand %p2593_p6, %p2587_p3 }
  0x88   :  { %2597 = shalt.err (!%p2594_p7)
}
  0x89   :  { %s2690_s4 = smov 512   ;;  %s2691_s21 = smov 32  }
  0x8a   :  { %102 = dma.hbm_to_vmem [thread:$0]  %s3222_s7, 4608, %s2845_s18, [#allocation12], %s2690_s4, %s2690_s4, %s2691_s21  }
  0x8b   :  { %s2692_s25 = smov [#allocation16]   ;;  %s2598_s8 = scalar_lea.hbm %s3225_s10, 16 }
  0x8c   :  { %s121_s26 = sshll.u32 %s2692_s25, 4  ;;  %p2599_p8 = scmp.ne.s32.totalorder %s3225_s10, %s2598_s8  ;;  %s122_s26 = int_to_ptr.vmem [resolvable:$true] %s121_s26 }
  0x8d   :  { %p2602_p9 = scmp.lt.u32.totalorder %s2598_s8, %s3225_s10 }
  0x8f   :  { %p2604_p10 = pnand %p2602_p9, %p2599_p8 }
  0x91   :  { %2607 = shalt.err (!%p2604_p10)
}
  0x92   :  { %s2608_s29 = scalar_lea.vmem %s122_s26, 16  ;;  %s2612_s7 = scalar_lea.vmem %s122_s26, 32 }
  0x93   :  { %p2609_p11 = scmp.ne.s32.totalorder %s122_s26, %s2608_s29  ;;  %p2613_p12 = scmp.lt.s32.totalorder %s122_s26, %s122_s26 }
  0x94   :  { %p2614_p13 = scmp.lt.s32.totalorder %s2612_s7, %s2608_s29 }
  0x96   :  { %p2615_p0 = por %p2614_p13, %p2613_p12 }
  0x98   :  { %p2616_p1 = pnand %p2615_p0, %p2609_p11 }
  0x9a   :  { %2619 = shalt.err (!%p2616_p1)
}
  0x9b   :  { %124 = dma.hbm_to_vmem [thread:$0]  %s3225_s10, 16, %s122_s26, [#allocation15]  }
  0x9c   :  { %2664 = dma.done.wait [#allocation3], 1408  }
  0x9d   :  { %2665 = vsyncadd [#allocation3], 4294965888 }
  0x9e   :  { %2666 = dma.done.wait [#allocation6], 45088  }
  0x9f   :  { %2667 = vsyncadd [#allocation6], 4294922208 }
  0xa0   :  { %2668 = dma.done.wait [#allocation9], 4112  }
  0xa1   :  { %2669 = vsyncadd [#allocation9], 4294963184 }
  0xa2   :  { %2670 = dma.done.wait [#allocation12], 4624  }
  0xa3   :  { %2671 = vsyncadd [#allocation12], 4294962672 }
  0xa4   :  { %2672 = dma.done.wait [#allocation15], 80  }
  0xa5   :  { %2673 = vsyncadd [#allocation15], 4294967216  ;;  %v277_v0 = vld [vmem:[#allocation5 + $0x208] sm:$0xff]  ;;  %v279_v1 = vld [vmem:[#allocation5 + $0x218] sm:$0xff]  ;;  %s2694_s10 = smov 78   ;;  %vm580_vm0 = vcmask 1043456  }
  0xa6   :  { %v276_v2 = vld [vmem:[#allocation5 + $0x200] sm:$0xff]  ;;  %v1939_v3 = vpack.c.bf16 %v279_v1, %v277_v0  ;;  %v278_v4 = vld [vmem:[#allocation5 + $0x210] sm:$0xff]  ;;  %v281_v5 = vld [vmem:[#allocation5 + $0x228] sm:$0xff]  ;;  %vm2695_vm1 = vmmov 1   ;;  %vm576_vm3 = vcmask 1014784   ;;  %s2696_s14 = smov 50  }
  0xa7   :  { %v283_v6 = vld [vmem:[#allocation5 + $0x238] sm:$0xff]  ;;  %v1941_v7 = vpack.c.bf16 %v278_v4, %v276_v2  ;;  %v280_v9 = vld [vmem:[#allocation5 + $0x220] sm:$0xff]  ;;  %v282_v10 = vld [vmem:[#allocation5 + $0x230] sm:$0xff]  ;;  %s2698_s16 = smov 51   ;;  %s2699_s17 = smov 110   ;;  %vm2702_vm4 = vmmov 0  }
  0xa8   :  { %v1943_v8 = vpack.c.bf16 %v283_v6, %v281_v5  ;;  %v285_v11 = vld [vmem:[#allocation5 + $0x248] sm:$0xff]  ;;  %1940 = vmatprep.subr.bf16.mxu0 %v1939_v3  ;;  %v287_v12 = vld [vmem:[#allocation5 + $0x258] sm:$0xff]  ;;  %v1945_v13 = vpack.c.bf16 %v282_v10, %v280_v9  ;;  %v284_v15 = vld [vmem:[#allocation5 + $0x240] sm:$0xff]  ;;  %s2700_s20 = smov 125   ;;  %s2701_s25 = smov 27   ;;  %vm206_vm5 = vcmask 23552  }
  0xa9   :  { %1942 = vmatpush1.bf16.msra.mxu0 %v1941_v7  ;;  %v1947_v14 = vpack.c.bf16 %v287_v12, %v285_v11  ;;  %v286_v16 = vld [vmem:[#allocation5 + $0x250] sm:$0xff]  ;;  %v289_v17 = vld [vmem:[#allocation5 + $0x268] sm:$0xff]  ;;  %v291_v18 = vld [vmem:[#allocation5 + $0x278] sm:$0xff]  ;;  %vm208_vm6 = vcmask 31744   ;;  %vm210_vm7 = vcmask 39936   ;;  %s2704_s3 = smov 64  }
  0xaa   :  { %1944 = vmatprep.subr.bf16.mxu0 %v1943_v8  ;;  %v1949_v19 = vpack.c.bf16 %v286_v16, %v284_v15  ;;  %v1951_v20 = vpack.c.bf16 %v291_v18, %v289_v17  ;;  %v288_v21 = vld [vmem:[#allocation5 + $0x260] sm:$0xff]  ;;  %v290_v22 = vld [vmem:[#allocation5 + $0x270] sm:$0xff]  ;;  %v293_v23 = vld [vmem:[#allocation5 + $0x288] sm:$0xff]  ;;  %vm1286_vm8 = vcmask 1045504   ;;  %vm1222_vm9 = vcmask 523264  }
  0xab   :  { %v295_v24 = vld [vmem:[#allocation5 + $0x298] sm:$0xff]  ;;  %v1953_v25 = vpack.c.bf16 %v290_v22, %v288_v21  ;;  %v292_v27 = vld [vmem:[#allocation5 + $0x280] sm:$0xff]  ;;  %v294_v28 = vld [vmem:[#allocation5 + $0x290] sm:$0xff]  ;;  %vm1282_vm10 = vcmask 572416  }
  0xac   :  { %v1955_v26 = vpack.c.bf16 %v295_v24, %v293_v23  ;;  %v297_v29 = vld [vmem:[#allocation5 + $0x2a8] sm:$0xff]  ;;  %v299_v30 = vld [vmem:[#allocation5 + $0x2b8] sm:$0xff]  ;;  %v1957_v31 = vpack.c.bf16 %v294_v28, %v292_v27  ;;  %v296_v33 = vld [vmem:[#allocation5 + $0x2a0] sm:$0xff] }
  0xad   :  { %1946 = vmatpush1.bf16.msra.mxu0 %v1945_v13  ;;  %v1959_v32 = vpack.c.bf16 %v299_v30, %v297_v29  ;;  %v298_v34 = vld [vmem:[#allocation5 + $0x2b0] sm:$0xff]  ;;  %v301_v35 = vld [vmem:[#allocation5 + $0x2c8] sm:$0xff]  ;;  %v303_v36 = vld [vmem:[#allocation5 + $0x2d8] sm:$0xff] }
  0xae   :  { %1948 = vmatprep.subr.bf16.mxu0 %v1947_v14  ;;  %v1961_v37 = vpack.c.bf16 %v298_v34, %v296_v33  ;;  %v1963_v38 = vpack.c.bf16 %v303_v36, %v301_v35  ;;  %v300_v39 = vld [vmem:[#allocation5 + $0x2c0] sm:$0xff]  ;;  %v302_v40 = vld [vmem:[#allocation5 + $0x2d0] sm:$0xff]  ;;  %v305_v42 = vld [vmem:[#allocation5 + $0x2e8] sm:$0xff] }
  0xaf   :  { %v155_v41 = vld [vmem:[#allocation2 + $0x18] sm:$0xff]  ;;  %v307_v43 = vld [vmem:[#allocation5 + $0x2f8] sm:$0xff]  ;;  %v1965_v44 = vpack.c.bf16 %v302_v40, %v300_v39  ;;  %v306_v47 = vld [vmem:[#allocation5 + $0x2f0] sm:$0xff] }
  0xb0   :  { %722 = vmatprep.mubr.f32.mxu0 %v155_v41  ;;  %v1967_v45 = vpack.c.bf16 %v307_v43, %v305_v42  ;;  %v304_v46 = vld [vmem:[#allocation5 + $0x2e0] sm:$0xff]  ;;  %v309_v48 = vld [vmem:[#allocation5 + $0x308] sm:$0xff]  ;;  %v311_v49 = vld [vmem:[#allocation5 + $0x318] sm:$0xff] }
  0xb1   :  { %1950 = vmatpush1.bf16.msra.mxu0 %v1949_v19  ;;  %v1969_v50 = vpack.c.bf16 %v306_v47, %v304_v46  ;;  %v1971_v51 = vpack.c.bf16 %v311_v49, %v309_v48  ;;  %v308_v52 = vld [vmem:[#allocation5 + $0x300] sm:$0xff]  ;;  %v310_v53 = vld [vmem:[#allocation5 + $0x310] sm:$0xff]  ;;  %v313_v54 = vld [vmem:[#allocation5 + $0x328] sm:$0xff] }
  0xb2   :  { %1952 = vmatprep.subr.bf16.mxu0 %v1951_v20  ;;  %v315_v55 = vld [vmem:[#allocation5 + $0x338] sm:$0xff]  ;;  %v1973_v56 = vpack.c.bf16 %v310_v53, %v308_v52  ;;  %v312_v58 = vld [vmem:[#allocation5 + $0x320] sm:$0xff]  ;;  %v314_v59 = vld [vmem:[#allocation5 + $0x330] sm:$0xff] }
  0xb3   :  { %v1975_v57 = vpack.c.bf16 %v315_v55, %v313_v54  ;;  %v317_v60 = vld [vmem:[#allocation5 + $0x348] sm:$0xff]  ;;  %v319_v61 = vld [vmem:[#allocation5 + $0x358] sm:$0xff]  ;;  %v1977_v62 = vpack.c.bf16 %v314_v59, %v312_v58  ;;  %v316_v0 = vld [vmem:[#allocation5 + $0x340] sm:$0xff] }
  0xb4   :  { %v1979_v63 = vpack.c.bf16 %v319_v61, %v317_v60  ;;  %v318_v1 = vld [vmem:[#allocation5 + $0x350] sm:$0xff]  ;;  %v321_v2 = vld [vmem:[#allocation5 + $0x368] sm:$0xff]  ;;  %v323_v3 = vld [vmem:[#allocation5 + $0x378] sm:$0xff] }
  0xb5   :  { %1954 = vmatpush1.bf16.msra.mxu0 %v1953_v25  ;;  %v1981_v4 = vpack.c.bf16 %v318_v1, %v316_v0  ;;  %v1983_v5 = vpack.c.bf16 %v323_v3, %v321_v2  ;;  %v320_v6 = vld [vmem:[#allocation5 + $0x360] sm:$0xff]  ;;  %v322_v7 = vld [vmem:[#allocation5 + $0x370] sm:$0xff]  ;;  %v325_v8 = vld [vmem:[#allocation5 + $0x388] sm:$0xff] }
  0xb6   :  { %1956 = vmatprep.subr.bf16.mxu0 %v1955_v26  ;;  %v327_v9 = vld [vmem:[#allocation5 + $0x398] sm:$0xff]  ;;  %v1985_v10 = vpack.c.bf16 %v322_v7, %v320_v6  ;;  %v324_v12 = vld [vmem:[#allocation5 + $0x380] sm:$0xff]  ;;  %v326_v13 = vld [vmem:[#allocation5 + $0x390] sm:$0xff] }
  0xb7   :  { %v1987_v11 = vpack.c.bf16 %v327_v9, %v325_v8  ;;  %v329_v14 = vld [vmem:[#allocation5 + $0x3a8] sm:$0xff]  ;;  %v331_v15 = vld [vmem:[#allocation5 + $0x3b8] sm:$0xff]  ;;  %v1989_v16 = vpack.c.bf16 %v326_v13, %v324_v12  ;;  %v328_v18 = vld [vmem:[#allocation5 + $0x3a0] sm:$0xff] }
  0xb8   :  { %v1991_v17 = vpack.c.bf16 %v331_v15, %v329_v14  ;;  %v330_v19 = vld [vmem:[#allocation5 + $0x3b0] sm:$0xff]  ;;  %v333_v20 = vld [vmem:[#allocation5 + $0x3c8] sm:$0xff]  ;;  %v335_v21 = vld [vmem:[#allocation5 + $0x3d8] sm:$0xff] }
  0xb9   :  { %1958 = vmatpush1.bf16.msra.mxu0 %v1957_v31  ;;  %v1993_v22 = vpack.c.bf16 %v330_v19, %v328_v18  ;;  %v1995_v23 = vpack.c.bf16 %v335_v21, %v333_v20  ;;  %v332_v24 = vld [vmem:[#allocation5 + $0x3c0] sm:$0xff]  ;;  %v334_v25 = vld [vmem:[#allocation5 + $0x3d0] sm:$0xff]  ;;  %v337_v26 = vld [vmem:[#allocation5 + $0x3e8] sm:$0xff] }
  0xba   :  { %1960 = vmatprep.subr.bf16.mxu0 %v1959_v32  ;;  %v339_v27 = vld [vmem:[#allocation5 + $0x3f8] sm:$0xff]  ;;  %v213_v28 = vld [vmem:[#allocation5 + $0x8] sm:$0xff]  ;;  %v1997_v30 = vpack.c.bf16 %v334_v25, %v332_v24  ;;  %v336_v31 = vld [vmem:[#allocation5 + $0x3e0] sm:$0xff] }
  0xbb   :  { %v215_v29 = vld [vmem:[#allocation5 + $0x18] sm:$0xff]  ;;  %v212_v33 = vld [vmem:[#allocation5] sm:$0xff]  ;;  %v1999_v34 = vpack.c.bf16 %v339_v27, %v337_v26  ;;  %v338_v35 = vld [vmem:[#allocation5 + $0x3f0] sm:$0xff] }
  0xbc   :  { %v1875_v32 = vpack.c.bf16 %v215_v29, %v213_v28  ;;  %v341_v36 = vld [vmem:[#allocation5 + $0x408] sm:$0xff]  ;;  %v219_v41 = vld [vmem:[#allocation5 + $0x38] sm:$0xff]  ;;  %v216_v43 = vld [vmem:[#allocation5 + $0x20] sm:$0xff] }
  0xbd   :  { %1962 = vmatpush1.bf16.msra.mxu0 %v1961_v37  ;;  %v214_v37 = vld [vmem:[#allocation5 + $0x10] sm:$0xff]  ;;  %v217_v40 = vld [vmem:[#allocation5 + $0x28] sm:$0xff]  ;;  %v340_v46 = vld [vmem:[#allocation5 + $0x400] sm:$0xff] }
  0xbe   :  { %1964 = vmatprep.subr.bf16.mxu0 %v1963_v38  ;;  %v343_v38 = vld [vmem:[#allocation5 + $0x418] sm:$0xff]  ;;  %1876 = vmatprep.subr.bf16.mxu1 %v1875_v32  ;;  %v1877_v39 = vpack.c.bf16 %v214_v37, %v212_v33  ;;  %v1879_v42 = vpack.c.bf16 %v219_v41, %v217_v40  ;;  %v221_v48 = vld [vmem:[#allocation5 + $0x48] sm:$0xff]  ;;  %v220_v55 = vld [vmem:[#allocation5 + $0x40] sm:$0xff] }
  0xbf   :  { %v2003_v49 = vpack.c.bf16 %v343_v38, %v341_v36  ;;  %v223_v52 = vld [vmem:[#allocation5 + $0x58] sm:$0xff]  ;;  %v344_v61 = vld [vmem:[#allocation5 + $0x420] sm:$0xff]  ;;  %v349_v0 = vld [vmem:[#allocation5 + $0x448] sm:$0xff] }
  0xc0   :  { %1878 = vmatpush1.bf16.msra.mxu1 %v1877_v39  ;;  %v347_v53 = vld [vmem:[#allocation5 + $0x438] sm:$0xff]  ;;  %v1883_v54 = vpack.c.bf16 %v223_v52, %v221_v48  ;;  %v157_v1 = vld [vmem:[#allocation2 + $0x28] sm:$0xff]  ;;  %v229_v7 = vld [vmem:[#allocation5 + $0x88] sm:$0xff] }
  0xc1   :  { %1966 = vmatpush1.bf16.msra.mxu0 %v1965_v44  ;;  %v218_v44 = vld [vmem:[#allocation5 + $0x30] sm:$0xff]  ;;  %1880 = vmatprep.subr.bf16.mxu1 %v1879_v42  ;;  %v227_v58 = vld [vmem:[#allocation5 + $0x78] sm:$0xff]  ;;  %v353_v13 = vld [vmem:[#allocation5 + $0x468] sm:$0xff] }
  0xc2   :  { %1968 = vmatprep.subr.bf16.mxu0 %v1967_v45  ;;  %v2001_v45 = vpack.c.bf16 %v338_v35, %v336_v31  ;;  %v1881_v47 = vpack.c.bf16 %v218_v44, %v216_v43  ;;  %v154_v59 = vld [vmem:[#allocation2 + $0x10] sm:$0xff]  ;;  %v226_v6 = vld [vmem:[#allocation5 + $0x70] sm:$0xff]  ;;  %v233_v19 = vld [vmem:[#allocation5 + $0xa8] sm:$0xff] }
  0xc3   :  { %v351_v3 = vld [vmem:[#allocation5 + $0x458] sm:$0xff]  ;;  %v350_v12 = vld [vmem:[#allocation5 + $0x450] sm:$0xff]  ;;  %v357_v25 = vld [vmem:[#allocation5 + $0x488] sm:$0xff] }
  0xc4   :  { %1882 = vmatpush1.bf16.msra.mxu1 %v1881_v47  ;;  %v231_v8 = vld [vmem:[#allocation5 + $0x98] sm:$0xff]  ;;  %v230_v18 = vld [vmem:[#allocation5 + $0x90] sm:$0xff]  ;;  %v232_v29 = vld [vmem:[#allocation5 + $0xa0] sm:$0xff] }
  0xc5   :  { %1970 = vmatpush1.bf16.msra.mxu0 %v1969_v50  ;;  %v342_v50 = vld [vmem:[#allocation5 + $0x410] sm:$0xff]  ;;  %1884 = vmatprep.subr.bf16.mxu1 %v1883_v54  ;;  %v355_v15 = vld [vmem:[#allocation5 + $0x478] sm:$0xff]  ;;  %v237_v31 = vld [vmem:[#allocation5 + $0xc8] sm:$0xff] }
  0xc6   :  { %1972 = vmatprep.subr.bf16.mxu0 %v1971_v51  ;;  %v345_v51 = vld [vmem:[#allocation5 + $0x428] sm:$0xff]  ;;  %v2005_v60 = vpack.c.bf16 %v342_v50, %v340_v46  ;;  %v235_v20 = vld [vmem:[#allocation5 + $0xb8] sm:$0xff]  ;;  %v354_v24 = vld [vmem:[#allocation5 + $0x470] sm:$0xff] }
  0xc7   :  { %v359_v27 = vld [vmem:[#allocation5 + $0x498] sm:$0xff]  ;;  %v1895_v28 = vpack.c.bf16 %v235_v20, %v233_v19  ;;  %v356_v35 = vld [vmem:[#allocation5 + $0x480] sm:$0xff]  ;;  %v358_v36 = vld [vmem:[#allocation5 + $0x490] sm:$0xff] }
  0xc8   :  { %v239_v32 = vld [vmem:[#allocation5 + $0xd8] sm:$0xff]  ;;  %v361_v37 = vld [vmem:[#allocation5 + $0x4a8] sm:$0xff]  ;;  %v236_v41 = vld [vmem:[#allocation5 + $0xc0] sm:$0xff] }
  0xc9   :  { %1974 = vmatpush1.bf16.msra.mxu0 %v1973_v56  ;;  %v222_v56 = vld [vmem:[#allocation5 + $0x50] sm:$0xff]  ;;  %v363_v39 = vld [vmem:[#allocation5 + $0x4b8] sm:$0xff]  ;;  %v1899_v40 = vpack.c.bf16 %v239_v32, %v237_v31  ;;  %v241_v43 = vld [vmem:[#allocation5 + $0xe8] sm:$0xff] }
  0xca   :  { %1976 = vmatprep.subr.bf16.mxu0 %v1975_v57  ;;  %v225_v57 = vld [vmem:[#allocation5 + $0x68] sm:$0xff]  ;;  %v1885_v2 = vpack.c.bf16 %v222_v56, %v220_v55  ;;  %v238_v42 = vld [vmem:[#allocation5 + $0xd0] sm:$0xff]  ;;  %v243_v44 = vld [vmem:[#allocation5 + $0xf8] sm:$0xff]  ;;  %v2023_v46 = vpack.c.bf16 %v363_v39, %v361_v37 }
  0xcb   :  { %v360_v47 = vld [vmem:[#allocation5 + $0x4a0] sm:$0xff]  ;;  %v362_v48 = vld [vmem:[#allocation5 + $0x4b0] sm:$0xff]  ;;  %v1901_v50 = vpack.c.bf16 %v238_v42, %v236_v41  ;;  %v1903_v52 = vpack.c.bf16 %v243_v44, %v241_v43  ;;  %v245_v55 = vld [vmem:[#allocation5 + $0x108] sm:$0xff] }
  0xcc   :  { %1886 = vmatpush1.bf16.msra.mxu1 %v1885_v2  ;;  %v242_v54 = vld [vmem:[#allocation5 + $0xf0] sm:$0xff]  ;;  %v247_v56 = vld [vmem:[#allocation5 + $0x118] sm:$0xff]  ;;  %v372_v19 = vld [vmem:[#allocation5 + $0x500] sm:$0xff] }
  0xcd   :  { %1978 = vmatpush1.bf16.msra.mxu0 %v1977_v62  ;;  %v2007_v62 = vpack.c.bf16 %v347_v53, %v345_v51  ;;  %v367_v51 = vld [vmem:[#allocation5 + $0x4d8] sm:$0xff]  ;;  %v240_v53 = vld [vmem:[#allocation5 + $0xe0] sm:$0xff]  ;;  %v246_v2 = vld [vmem:[#allocation5 + $0x110] sm:$0xff] }
  0xce   :  { %1980 = vmatprep.subr.bf16.mxu0 %v1979_v63  ;;  %v346_v63 = vld [vmem:[#allocation5 + $0x430] sm:$0xff]  ;;  %v256_v37 = vld [vmem:[#allocation5 + $0x160] sm:$0xff]  ;;  %v263_v41 = vld [vmem:[#allocation5 + $0x198] sm:$0xff] }
  0xcf   :  { %v2009_v9 = vpack.c.bf16 %v346_v63, %v344_v61  ;;  %v369_v61 = vld [vmem:[#allocation5 + $0x4e8] sm:$0xff]  ;;  %v371_v63 = vld [vmem:[#allocation5 + $0x4f8] sm:$0xff]  ;;  %v374_v20 = vld [vmem:[#allocation5 + $0x510] sm:$0xff] }
  0xd0   :  { %v378_v32 = vld [vmem:[#allocation5 + $0x530] sm:$0xff]  ;;  %v380_v44 = vld [vmem:[#allocation5 + $0x540] sm:$0xff]  ;;  %vm2900_vm2 = vmpackc.low %vm580_vm0, %vm2695_vm1 }
  0xd1   :  { %1982 = vmatpush1.bf16.msra.mxu0 %v1981_v4  ;;  %v1887_v4 = vpack.c.bf16 %v227_v58, %v225_v57  ;;  %v2025_v57 = vpack.c.bf16 %v362_v48, %v360_v47  ;;  %v2889_v39 = vld [vmem:[#allocation2 + $0x8] sm:$0xff]  ;;  %v387_v48 = vld [vmem:[#allocation5 + $0x578] sm:$0xff] }
  0xd2   :  { %1984 = vmatprep.subr.bf16.mxu0 %v1983_v5  ;;  %v224_v5 = vld [vmem:[#allocation5 + $0x60] sm:$0xff]  ;;  %651 = vmatprep.mubr.f32.mxu1 %v2889_v39 }
  0xd3   :  { %v1889_v14 = vpack.c.bf16 %v226_v6, %v224_v5  ;;  %1888 = vmatprep.subr.bf16.mxu1 %v1887_v4  ;;  %v251_v4 = vld [vmem:[#allocation5 + $0x138] sm:$0xff]  ;;  %v2031_v6 = vpack.c.bf16 %v371_v63, %v369_v61  ;;  %v266_v63 = vld [vmem:[#allocation5 + $0x1b0] sm:$0xff] }
  0xd5   :  { %1986 = vmatpush1.bf16.msra.mxu0 %v1985_v10  ;;  %v2011_v10 = vpack.c.bf16 %v351_v3, %v349_v0  ;;  %1890 = vmatpush1.bf16.msra.mxu1 %v1889_v14  ;;  %v1907_v0 = vpack.c.bf16 %v247_v56, %v245_v55  ;;  %v249_v3 = vld [vmem:[#allocation5 + $0x128] sm:$0xff]  ;;  %v250_v14 = vld [vmem:[#allocation5 + $0x130] sm:$0xff]  ;;  %v384_v56 = vld [vmem:[#allocation5 + $0x560] sm:$0xff] }
  0xd6   :  { %1988 = vmatprep.subr.bf16.mxu0 %v1987_v11  ;;  %v348_v11 = vld [vmem:[#allocation5 + $0x440] sm:$0xff] }
  0xd7   :  { %v2013_v21 = vpack.c.bf16 %v350_v12, %v348_v11  ;;  %v375_v11 = vld [vmem:[#allocation5 + $0x518] sm:$0xff]  ;;  %v1911_v12 = vpack.c.bf16 %v251_v4, %v249_v3  ;;  %v388_v4 = vld [vmem:[#allocation5 + $0x580] sm:$0xff] }
  0xd9   :  { %1990 = vmatpush1.bf16.msra.mxu0 %v1989_v16  ;;  %v1891_v16 = vpack.c.bf16 %v231_v8, %v229_v7  ;;  %v368_v7 = vld [vmem:[#allocation5 + $0x4e0] sm:$0xff]  ;;  %v370_v8 = vld [vmem:[#allocation5 + $0x4f0] sm:$0xff] }
  0xda   :  { %1992 = vmatprep.subr.bf16.mxu0 %v1991_v17  ;;  %v228_v17 = vld [vmem:[#allocation5 + $0x80] sm:$0xff] }
  0xdb   :  { %v1893_v26 = vpack.c.bf16 %v230_v18, %v228_v17  ;;  %1892 = vmatprep.subr.bf16.mxu1 %v1891_v16  ;;  %v255_v16 = vld [vmem:[#allocation5 + $0x158] sm:$0xff]  ;;  %v2033_v17 = vpack.c.bf16 %v370_v8, %v368_v7 }
  0xdc   :  { %v395_v8 = vld [vmem:[#allocation5 + $0x5b8] sm:$0xff] }
  0xdd   :  { %1994 = vmatpush1.bf16.msra.mxu0 %v1993_v22  ;;  %v2015_v22 = vpack.c.bf16 %v355_v15, %v353_v13  ;;  %1894 = vmatpush1.bf16.msra.mxu1 %v1893_v26  ;;  %v248_v13 = vld [vmem:[#allocation5 + $0x120] sm:$0xff]  ;;  %v253_v15 = vld [vmem:[#allocation5 + $0x148] sm:$0xff]  ;;  %v254_v26 = vld [vmem:[#allocation5 + $0x150] sm:$0xff] }
  0xde   :  { %1996 = vmatprep.subr.bf16.mxu0 %v1995_v23  ;;  %v352_v23 = vld [vmem:[#allocation5 + $0x460] sm:$0xff]  ;;  %1896 = vmatprep.subr.bf16.mxu1 %v1895_v28  ;;  %v259_v28 = vld [vmem:[#allocation5 + $0x178] sm:$0xff] }
  0xdf   :  { %v2017_v33 = vpack.c.bf16 %v354_v24, %v352_v23  ;;  %v379_v23 = vld [vmem:[#allocation5 + $0x538] sm:$0xff]  ;;  %v1915_v24 = vpack.c.bf16 %v255_v16, %v253_v15  ;;  %v392_v16 = vld [vmem:[#allocation5 + $0x5a0] sm:$0xff] }
  0xe1   :  { %1998 = vmatpush1.bf16.msra.mxu0 %v1997_v30  ;;  %v234_v30 = vld [vmem:[#allocation5 + $0xb0] sm:$0xff] }
  0xe2   :  { %2000 = vmatprep.subr.bf16.mxu0 %v1999_v34  ;;  %v2019_v34 = vpack.c.bf16 %v359_v27, %v357_v25  ;;  %v1897_v38 = vpack.c.bf16 %v234_v30, %v232_v29  ;;  %v252_v25 = vld [vmem:[#allocation5 + $0x140] sm:$0xff]  ;;  %v257_v27 = vld [vmem:[#allocation5 + $0x168] sm:$0xff]  ;;  %v2037_v29 = vpack.c.bf16 %v374_v20, %v372_v19  ;;  %v399_v20 = vld [vmem:[#allocation5 + $0x5d8] sm:$0xff] }
  0xe3   :  { %v376_v30 = vld [vmem:[#allocation5 + $0x520] sm:$0xff] }
  0xe4   :  { %1898 = vmatpush1.bf16.msra.mxu1 %v1897_v38  ;;  %v258_v38 = vld [vmem:[#allocation5 + $0x170] sm:$0xff]  ;;  %v2041_v42 = vpack.c.bf16 %v378_v32, %v376_v30  ;;  %v401_v30 = vld [vmem:[#allocation5 + $0x5e8] sm:$0xff]  ;;  %v403_v32 = vld [vmem:[#allocation5 + $0x5f8] sm:$0xff] }
  0xe5   :  { %2002 = vmatpush1.bf16.msra.mxu0 %v2001_v45  ;;  %v2021_v45 = vpack.c.bf16 %v358_v36, %v356_v35  ;;  %1900 = vmatprep.subr.bf16.mxu1 %v1899_v40  ;;  %v1917_v35 = vpack.c.bf16 %v254_v26, %v252_v25  ;;  %v1919_v36 = vpack.c.bf16 %v259_v28, %v257_v27  ;;  %v261_v40 = vld [vmem:[#allocation5 + $0x188] sm:$0xff]  ;;  %v535_v25 = vld [vmem:[#allocation5 + $0xa18] sm:$0xff]  ;;  %v396_v28 = vld [vmem:[#allocation5 + $0x5c0] sm:$0xff] }
  0xe6   :  { %2004 = vmatprep.subr.bf16.mxu0 %v2003_v49  ;;  %v365_v49 = vld [vmem:[#allocation5 + $0x4c8] sm:$0xff]  ;;  %v1921_v47 = vpack.c.bf16 %v258_v38, %v256_v37  ;;  %v539_v37 = vld [vmem:[#allocation5 + $0xa38] sm:$0xff] }
  0xe7   :  { %v2027_v58 = vpack.c.bf16 %v367_v51, %v365_v49  ;;  %v1923_v49 = vpack.c.bf16 %v263_v41, %v261_v40  ;;  %v262_v51 = vld [vmem:[#allocation5 + $0x190] sm:$0xff]  ;;  %v400_v40 = vld [vmem:[#allocation5 + $0x5e0] sm:$0xff]  ;;  %v2063_v41 = vpack.c.bf16 %v403_v32, %v401_v30  ;;  %v421_v32 = vld [vmem:[#allocation5 + $0x688] sm:$0xff] }
  0xe8   :  { %723 = vmatmul.mubr.f32.vlgmr.msra.gmra.mrb[0].mxu0 %v154_v59  ;;  %v364_v59 = vld [vmem:[#allocation5 + $0x4c0] sm:$0xff]  ;;  %1902 = vmatpush1.bf16.msra.mxu1 %v1901_v50 }
  0xe9   :  { %2006 = vmatpush1.bf16.msra.mxu0 %v2005_v60  ;;  %793 = vmatprep.mubr.f32.mxu0 %v157_v1  ;;  %v366_v60 = vld [vmem:[#allocation5 + $0x4d0] sm:$0xff]  ;;  %v244_v1 = vld [vmem:[#allocation5 + $0x100] sm:$0xff] }
  0xea   :  { %2008 = vmatprep.subr.bf16.mxu0 %v2007_v62  ;;  %v1905_v62 = vpack.c.bf16 %v242_v54, %v240_v53  ;;  %1904 = vmatprep.subr.bf16.mxu1 %v1903_v52  ;;  %v2029_v5 = vpack.c.bf16 %v366_v60, %v364_v59  ;;  %v260_v50 = vld [vmem:[#allocation5 + $0x180] sm:$0xff]  ;;  %v265_v52 = vld [vmem:[#allocation5 + $0x1a8] sm:$0xff]  ;;  %v267_v53 = vld [vmem:[#allocation5 + $0x1b8] sm:$0xff] }
  0xeb   :  { %v1925_v59 = vpack.c.bf16 %v262_v51, %v260_v50  ;;  %v391_v60 = vld [vmem:[#allocation5 + $0x598] sm:$0xff]  ;;  %v1927_v61 = vpack.c.bf16 %v267_v53, %v265_v52  ;;  %v541_v50 = vld [vmem:[#allocation5 + $0xa48] sm:$0xff]  ;;  %v416_v30 = vld [vmem:[#allocation5 + $0x660] sm:$0xff] }
  0xec   :  { %1906 = vmatpush1.bf16.msra.mxu1 %v1905_v62  ;;  %v264_v62 = vld [vmem:[#allocation5 + $0x1a0] sm:$0xff]  ;;  %v543_v51 = vld [vmem:[#allocation5 + $0xa58] sm:$0xff] }
  0xed   :  { %2010 = vmatpush1.bf16.msra.mxu0 %v2009_v9  ;;  %v373_v9 = vld [vmem:[#allocation5 + $0x508] sm:$0xff]  ;;  %1908 = vmatprep.subr.bf16.mxu1 %v1907_v0  ;;  %v1929_v7 = vpack.c.bf16 %v266_v63, %v264_v62  ;;  %v547_v63 = vld [vmem:[#allocation5 + $0xa78] sm:$0xff] }
  0xee   :  { %2012 = vmatprep.subr.bf16.mxu0 %v2011_v10  ;;  %v1909_v10 = vpack.c.bf16 %v246_v2, %v244_v1  ;;  %v2035_v18 = vpack.c.bf16 %v375_v11, %v373_v9  ;;  %v269_v0 = vld [vmem:[#allocation5 + $0x1c8] sm:$0xff]  ;;  %v271_v1 = vld [vmem:[#allocation5 + $0x1d8] sm:$0xff]  ;;  %v270_v11 = vld [vmem:[#allocation5 + $0x1d0] sm:$0xff] }
  0xef   :  { %v1931_v9 = vpack.c.bf16 %v271_v1, %v269_v0  ;;  %v545_v62 = vld [vmem:[#allocation5 + $0xa68] sm:$0xff] }
  0xf0   :  { %1910 = vmatpush1.bf16.msra.mxu1 %v1909_v10  ;;  %v268_v10 = vld [vmem:[#allocation5 + $0x1c0] sm:$0xff]  ;;  %v156_v0 = vld [vmem:[#allocation2 + $0x20] sm:$0xff] }
  0xf1   :  { %2014 = vmatpush1.bf16.msra.mxu0 %v2013_v21  ;;  %v377_v21 = vld [vmem:[#allocation5 + $0x528] sm:$0xff]  ;;  %1912 = vmatprep.subr.bf16.mxu1 %v1911_v12  ;;  %v1933_v19 = vpack.c.bf16 %v270_v11, %v268_v10  ;;  %v544_v10 = vld [vmem:[#allocation5 + $0xa60] sm:$0xff]  ;;  %v546_v11 = vld [vmem:[#allocation5 + $0xa70] sm:$0xff] }
  0xf2   :  { %2016 = vmatprep.subr.bf16.mxu0 %v2015_v22  ;;  %v1913_v22 = vpack.c.bf16 %v250_v14, %v248_v13  ;;  %v2039_v31 = vpack.c.bf16 %v379_v23, %v377_v21  ;;  %v273_v12 = vld [vmem:[#allocation5 + $0x1e8] sm:$0xff]  ;;  %v275_v13 = vld [vmem:[#allocation5 + $0x1f8] sm:$0xff]  ;;  %v274_v23 = vld [vmem:[#allocation5 + $0x1f0] sm:$0xff] }
  0xf3   :  { %v1935_v21 = vpack.c.bf16 %v275_v13, %v273_v12  ;;  %v549_v12 = vld [vmem:[#allocation5 + $0xa88] sm:$0xff]  ;;  %v551_v13 = vld [vmem:[#allocation5 + $0xa98] sm:$0xff] }
  0xf4   :  { %1914 = vmatpush1.bf16.msra.mxu1 %v1913_v22  ;;  %v272_v22 = vld [vmem:[#allocation5 + $0x1e0] sm:$0xff] }
  0xf5   :  { %2018 = vmatpush1.bf16.msra.mxu0 %v2017_v33  ;;  %v381_v33 = vld [vmem:[#allocation5 + $0x548] sm:$0xff]  ;;  %1916 = vmatprep.subr.bf16.mxu1 %v1915_v24 }
  0xf6   :  { %2020 = vmatprep.subr.bf16.mxu0 %v2019_v34  ;;  %v383_v34 = vld [vmem:[#allocation5 + $0x558] sm:$0xff]  ;;  %v533_v24 = vld [vmem:[#allocation5 + $0xa08] sm:$0xff] }
  0xf7   :  { %v2043_v43 = vpack.c.bf16 %v383_v34, %v381_v33  ;;  %v2195_v33 = vpack.c.bf16 %v535_v25, %v533_v24  ;;  %v532_v34 = vld [vmem:[#allocation5 + $0xa00] sm:$0xff]  ;;  %v550_v25 = vld [vmem:[#allocation5 + $0xa90] sm:$0xff] }
  0xf8   :  { %1918 = vmatpush1.bf16.msra.mxu1 %v1917_v35  ;;  %v534_v35 = vld [vmem:[#allocation5 + $0xa10] sm:$0xff]  ;;  %v548_v24 = vld [vmem:[#allocation5 + $0xa80] sm:$0xff] }
  0xf9   :  { %2022 = vmatpush1.bf16.msra.mxu0 %v2021_v45  ;;  %v382_v45 = vld [vmem:[#allocation5 + $0x550] sm:$0xff]  ;;  %1920 = vmatprep.subr.bf16.mxu1 %v1919_v36  ;;  %v537_v36 = vld [vmem:[#allocation5 + $0xa28] sm:$0xff] }
  0xfa   :  { %2024 = vmatprep.subr.bf16.mxu0 %v2023_v46  ;;  %v385_v46 = vld [vmem:[#allocation5 + $0x568] sm:$0xff]  ;;  %v2045_v54 = vpack.c.bf16 %v382_v45, %v380_v44  ;;  %v2197_v45 = vpack.c.bf16 %v534_v35, %v532_v34  ;;  %v423_v34 = vld [vmem:[#allocation5 + $0x698] sm:$0xff] }
  0xfb   :  { %v2047_v55 = vpack.c.bf16 %v387_v48, %v385_v46  ;;  %v2892_v44 = vld [vmem:[#allocation2] sm:$0xff]  ;;  %v407_v46 = vld [vmem:[#allocation5 + $0x618] sm:$0xff]  ;;  %v536_v48 = vld [vmem:[#allocation5 + $0xa20] sm:$0xff] }
  0xfc   :  { %1922 = vmatpush1.bf16.msra.mxu1 %v1921_v47  ;;  %v2199_v47 = vpack.c.bf16 %v539_v37, %v537_v36  ;;  %v552_v36 = vld [vmem:[#allocation5 + $0xaa0] sm:$0xff]  ;;  %v554_v37 = vld [vmem:[#allocation5 + $0xab0] sm:$0xff]  ;;  %175 = vrot.lane.b32.xlu1 %v2892_v44, %s2696_s14 }
  0xfd   :  { %2026 = vmatpush1.bf16.msra.mxu0 %v2025_v57  ;;  %v386_v57 = vld [vmem:[#allocation5 + $0x570] sm:$0xff]  ;;  %1924 = vmatprep.subr.bf16.mxu1 %v1923_v49 }
  0xfe   :  { %2028 = vmatprep.subr.bf16.mxu0 %v2027_v58  ;;  %v389_v58 = vld [vmem:[#allocation5 + $0x588] sm:$0xff]  ;;  %v2049_v2 = vpack.c.bf16 %v386_v57, %v384_v56  ;;  %v538_v49 = vld [vmem:[#allocation5 + $0xa30] sm:$0xff] }
  0xff   :  { %v2051_v3 = vpack.c.bf16 %v391_v60, %v389_v58  ;;  %v409_v56 = vld [vmem:[#allocation5 + $0x628] sm:$0xff]  ;;  %v2201_v57 = vpack.c.bf16 %v538_v49, %v536_v48  ;;  %v411_v58 = vld [vmem:[#allocation5 + $0x638] sm:$0xff]  ;;  %v540_v60 = vld [vmem:[#allocation5 + $0xa40] sm:$0xff] }
 0x100   :  { %1926 = vmatpush1.bf16.msra.mxu1 %v1925_v59  ;;  %v2203_v59 = vpack.c.bf16 %v543_v51, %v541_v50  ;;  %v427_v48 = vld [vmem:[#allocation5 + $0x6b8] sm:$0xff]  ;;  %v556_v50 = vld [vmem:[#allocation5 + $0xac0] sm:$0xff]  ;;  %v558_v51 = vld [vmem:[#allocation5 + $0xad0] sm:$0xff]  ;;  %180 = vrot.lane.b32.xlu1 %v2889_v39, %s2696_s14 }
 0x101   :  { %2030 = vmatpush1.bf16.msra.mxu0 %v2029_v5  ;;  %v390_v5 = vld [vmem:[#allocation5 + $0x590] sm:$0xff]  ;;  %1928 = vmatprep.subr.bf16.mxu1 %v1927_v61 }
 0x102   :  { %2032 = vmatprep.subr.bf16.mxu0 %v2031_v6  ;;  %v393_v6 = vld [vmem:[#allocation5 + $0x5a8] sm:$0xff]  ;;  %v2053_v14 = vpack.c.bf16 %v390_v5, %v388_v4  ;;  %v542_v61 = vld [vmem:[#allocation5 + $0xa50] sm:$0xff] }
 0x103   :  { %v2055_v15 = vpack.c.bf16 %v395_v8, %v393_v6  ;;  %v410_v4 = vld [vmem:[#allocation5 + $0x630] sm:$0xff]  ;;  %v413_v5 = vld [vmem:[#allocation5 + $0x648] sm:$0xff]  ;;  %v159_v6 = vld [vmem:[#allocation2 + $0x38] sm:$0xff] }
 0x104   :  { %1930 = vmatpush1.bf16.msra.mxu1 %v1929_v7  ;;  %v2205_v7 = vpack.c.bf16 %v542_v61, %v540_v60  ;;  %v415_v8 = vld [vmem:[#allocation5 + $0x658] sm:$0xff] }
 0x105   :  { %2034 = vmatpush1.bf16.msra.mxu0 %v2033_v17  ;;  %v394_v17 = vld [vmem:[#allocation5 + $0x5b0] sm:$0xff]  ;;  %1932 = vmatprep.subr.bf16.mxu1 %v1931_v9  ;;  %v2207_v9 = vpack.c.bf16 %v547_v63, %v545_v62  ;;  %v431_v60 = vld [vmem:[#allocation5 + $0x6d8] sm:$0xff]  ;;  %v560_v62 = vld [vmem:[#allocation5 + $0xae0] sm:$0xff] }
 0x106   :  { %2036 = vmatprep.subr.bf16.mxu0 %v2035_v18  ;;  %v397_v18 = vld [vmem:[#allocation5 + $0x5c8] sm:$0xff]  ;;  %v2057_v26 = vpack.c.bf16 %v394_v17, %v392_v16  ;;  %v412_v16 = vld [vmem:[#allocation5 + $0x640] sm:$0xff]  ;;  %v2075_v17 = vpack.c.bf16 %v415_v8, %v413_v5  ;;  %v562_v63 = vld [vmem:[#allocation5 + $0xaf0] sm:$0xf] }
 0x107   :  { %v2059_v27 = vpack.c.bf16 %v399_v20, %v397_v18  ;;  %v414_v18 = vld [vmem:[#allocation5 + $0x650] sm:$0xff]  ;;  %v2896_v20 = vld [vmem:[#allocation2 + $0x30] sm:$0xff]  ;;  %v2226_v5 = vpack.c.bf16 %v562_v63, %v560_v62  ;;  %v464_v63 = vld [vmem:[#allocation5 + $0x7e0] sm:$0xff] }
 0x108   :  { %1934 = vmatpush1.bf16.msra.mxu1 %v1933_v19  ;;  %v417_v19 = vld [vmem:[#allocation5 + $0x668] sm:$0xff]  ;;  %164 = vrot.lane.b32.xlu0 %v2896_v20, %s2694_s10 }
 0x109   :  { %2038 = vmatpush1.bf16.msra.mxu0 %v2037_v29  ;;  %v398_v29 = vld [vmem:[#allocation5 + $0x5d0] sm:$0xff]  ;;  %1936 = vmatprep.subr.bf16.mxu1 %v1935_v21  ;;  %v2209_v21 = vpack.c.bf16 %v546_v11, %v544_v10  ;;  %v432_v10 = vld [vmem:[#allocation5 + $0x6e0] sm:$0xff] }
 0x10a   :  { %2040 = vmatprep.subr.bf16.mxu0 %v2039_v31  ;;  %v1937_v31 = vpack.c.bf16 %v274_v23, %v272_v22  ;;  %v2061_v38 = vpack.c.bf16 %v398_v29, %v396_v28  ;;  %v419_v22 = vld [vmem:[#allocation5 + $0x678] sm:$0xff]  ;;  %v2211_v23 = vpack.c.bf16 %v551_v13, %v549_v12  ;;  %v2077_v28 = vpack.c.bf16 %v414_v18, %v412_v16  ;;  %v434_v11 = vld [vmem:[#allocation5 + $0x6f0] sm:$0xff]  ;;  %v437_v13 = vld [vmem:[#allocation5 + $0x708] sm:$0xff] }
 0x10b   :  { %v2079_v29 = vpack.c.bf16 %v419_v22, %v417_v19  ;;  %v162_v12 = vld [vmem:[#allocation2 + $0x50] sm:$0xff]  ;;  %v2097_v16 = vpack.c.bf16 %v434_v11, %v432_v10  ;;  %v436_v18 = vld [vmem:[#allocation5 + $0x700] sm:$0xff]  ;;  %v438_v19 = vld [vmem:[#allocation5 + $0x710] sm:$0xff] }
 0x10c   :  { %1938 = vmatpush1.bf16.msra.mxu1 %v1937_v31  ;;  %v418_v31 = vld [vmem:[#allocation5 + $0x670] sm:$0xff]  ;;  %v443_v22 = vld [vmem:[#allocation5 + $0x738] sm:$0xff]  ;;  %v472_v11 = vld [vmem:[#allocation5 + $0x820] sm:$0xff] }
 0x10d   :  { %2042 = vmatpush1.bf16.msra.mxu0 %v2041_v42  ;;  %v402_v42 = vld [vmem:[#allocation5 + $0x5f0] sm:$0xff]  ;;  %2196 = vmatprep.subr.bf16.mxu1 %v2195_v33  ;;  %v2213_v33 = vpack.c.bf16 %v550_v25, %v548_v24  ;;  %v440_v25 = vld [vmem:[#allocation5 + $0x720] sm:$0xff] }
 0x10e   :  { %2044 = vmatprep.subr.bf16.mxu0 %v2043_v43  ;;  %v405_v43 = vld [vmem:[#allocation5 + $0x608] sm:$0xff]  ;;  %v2065_v52 = vpack.c.bf16 %v402_v42, %v400_v40  ;;  %v559_v40 = vld [vmem:[#allocation5 + $0xad8] sm:$0xff]  ;;  %v2083_v42 = vpack.c.bf16 %v423_v34, %v421_v32  ;;  %v446_v32 = vld [vmem:[#allocation5 + $0x750] sm:$0xff] }
 0x10f   :  { %652 = vmatmul.mubr.f32.vlgmr.msra.gmra.mrb[0].mxu1 %v2892_v44  ;;  %v2067_v53 = vpack.c.bf16 %v407_v46, %v405_v43  ;;  %v420_v43 = vld [vmem:[#allocation5 + $0x680] sm:$0xff]  ;;  %v425_v46 = vld [vmem:[#allocation5 + $0x6a8] sm:$0xff]  ;;  %v451_v34 = vld [vmem:[#allocation5 + $0x778] sm:$0xff] }
 0x110   :  { %2198 = vmatpush1.bf16.msra.mxu1 %v2197_v45  ;;  %v422_v45 = vld [vmem:[#allocation5 + $0x690] sm:$0xff] }
 0x111   :  { %2046 = vmatpush1.bf16.msra.mxu0 %v2045_v54  ;;  %v404_v54 = vld [vmem:[#allocation5 + $0x600] sm:$0xff]  ;;  %2200 = vmatprep.subr.bf16.mxu1 %v2199_v47  ;;  %v2217_v47 = vpack.c.bf16 %v554_v37, %v552_v36 }
 0x112   :  { %2048 = vmatprep.subr.bf16.mxu0 %v2047_v55  ;;  %v406_v55 = vld [vmem:[#allocation5 + $0x610] sm:$0xff]  ;;  %v448_v37 = vld [vmem:[#allocation5 + $0x760] sm:$0xff] }
 0x113   :  { %v2069_v1 = vpack.c.bf16 %v406_v55, %v404_v54  ;;  %v2085_v54 = vpack.c.bf16 %v422_v45, %v420_v43  ;;  %v2087_v55 = vpack.c.bf16 %v427_v48, %v425_v46  ;;  %v452_v45 = vld [vmem:[#allocation5 + $0x780] sm:$0xff]  ;;  %v454_v46 = vld [vmem:[#allocation5 + $0x790] sm:$0xff]  ;;  %v459_v48 = vld [vmem:[#allocation5 + $0x7b8] sm:$0xff] }
 0x114   :  { %2202 = vmatpush1.bf16.msra.mxu1 %v2201_v57  ;;  %v426_v57 = vld [vmem:[#allocation5 + $0x6b0] sm:$0xff] }
 0x115   :  { %2050 = vmatpush1.bf16.msra.mxu0 %v2049_v2  ;;  %v408_v2 = vld [vmem:[#allocation5 + $0x620] sm:$0xff]  ;;  %2204 = vmatprep.subr.bf16.mxu1 %v2203_v59  ;;  %v2221_v59 = vpack.c.bf16 %v558_v51, %v556_v50 }
 0x116   :  { %2052 = vmatprep.subr.bf16.mxu0 %v2051_v3  ;;  %v2071_v3 = vpack.c.bf16 %v411_v58, %v409_v56  ;;  %v424_v56 = vld [vmem:[#allocation5 + $0x6a0] sm:$0xff]  ;;  %v429_v58 = vld [vmem:[#allocation5 + $0x6c8] sm:$0xff] }
 0x117   :  { %v456_v51 = vld [vmem:[#allocation5 + $0x7a0] sm:$0xff] }
 0x118   :  { %2206 = vmatpush1.bf16.msra.mxu1 %v2205_v7  ;;  %v435_v7 = vld [vmem:[#allocation5 + $0x6f8] sm:$0xff] }
 0x119   :  { %2054 = vmatpush1.bf16.msra.mxu0 %v2053_v14  ;;  %v2693_v14 = vmov 0.0   ;;  %2208 = vmatprep.subr.bf16.mxu1 %v2207_v9 }
 0x11a   :  { %2056 = vmatprep.subr.bf16.mxu0 %v2055_v15  ;;  %1006 = vmatprep.mubr.f32.mxu1 %v2693_v14  ;;  %v2073_v15 = vpack.c.bf16 %v410_v4, %v408_v2  ;;  %v2091_v2 = vpack.c.bf16 %v431_v60, %v429_v58  ;;  %v430_v4 = vld [vmem:[#allocation5 + $0x6d0] sm:$0xff]  ;;  %v467_v60 = vld [vmem:[#allocation5 + $0x7f8] sm:$0xff] }
 0x11b   :  { %v462_v58 = vld [vmem:[#allocation5 + $0x7d0] sm:$0xff] }
 0x11c   :  { %2210 = vmatpush1.bf16.msra.mxu1 %v2209_v21  ;;  %v441_v21 = vld [vmem:[#allocation5 + $0x728] sm:$0xff] }
 0x11d   :  { %2058 = vmatpush1.bf16.msra.mxu0 %v2057_v26  ;;  %v553_v26 = vld [vmem:[#allocation5 + $0xaa8] sm:$0xff]  ;;  %2212 = vmatprep.subr.bf16.mxu1 %v2211_v23  ;;  %v2101_v23 = vpack.c.bf16 %v438_v19, %v436_v18  ;;  %v2103_v24 = vpack.c.bf16 %v443_v22, %v441_v21  ;;  %v476_v19 = vld [vmem:[#allocation5 + $0x840] sm:$0xff]  ;;  %v478_v21 = vld [vmem:[#allocation5 + $0x850] sm:$0xff] }
 0x11e   :  { %2060 = vmatprep.subr.bf16.mxu0 %v2059_v27  ;;  %v555_v27 = vld [vmem:[#allocation5 + $0xab8] sm:$0xff]  ;;  %v481_v22 = vld [vmem:[#allocation5 + $0x868] sm:$0xff] }
 0x11f   :  { %v2215_v35 = vpack.c.bf16 %v555_v27, %v553_v26  ;;  %v442_v26 = vld [vmem:[#allocation5 + $0x730] sm:$0xff]  ;;  %v445_v27 = vld [vmem:[#allocation5 + $0x748] sm:$0xff] }
 0x120   :  { %2214 = vmatpush1.bf16.msra.mxu1 %v2213_v33  ;;  %v449_v33 = vld [vmem:[#allocation5 + $0x768] sm:$0xff] }
 0x121   :  { %2062 = vmatpush1.bf16.msra.mxu0 %v2061_v38  ;;  %v557_v38 = vld [vmem:[#allocation5 + $0xac8] sm:$0xff]  ;;  %2216 = vmatprep.subr.bf16.mxu1 %v2215_v35  ;;  %v2111_v36 = vpack.c.bf16 %v451_v34, %v449_v33  ;;  %v486_v33 = vld [vmem:[#allocation5 + $0x890] sm:$0xff] }
 0x122   :  { %2064 = vmatprep.subr.bf16.mxu0 %v2063_v41  ;;  %v2081_v41 = vpack.c.bf16 %v418_v31, %v416_v30  ;;  %v2219_v49 = vpack.c.bf16 %v559_v40, %v557_v38  ;;  %v444_v31 = vld [vmem:[#allocation5 + $0x740] sm:$0xff]  ;;  %v450_v38 = vld [vmem:[#allocation5 + $0x770] sm:$0xff]  ;;  %v453_v40 = vld [vmem:[#allocation5 + $0x788] sm:$0xff] }
 0x123   :  { %v2109_v35 = vpack.c.bf16 %v446_v32, %v444_v31  ;;  %v484_v32 = vld [vmem:[#allocation5 + $0x880] sm:$0xff]  ;;  %v489_v34 = vld [vmem:[#allocation5 + $0x8a8] sm:$0xff] }
 0x124   :  { %2218 = vmatpush1.bf16.msra.mxu1 %v2217_v47  ;;  %v457_v47 = vld [vmem:[#allocation5 + $0x7a8] sm:$0xff] }
 0x125   :  { %2066 = vmatpush1.bf16.msra.mxu0 %v2065_v52  ;;  %v561_v52 = vld [vmem:[#allocation5 + $0xae8] sm:$0xff]  ;;  %2220 = vmatprep.subr.bf16.mxu1 %v2219_v49  ;;  %v2117_v49 = vpack.c.bf16 %v454_v46, %v452_v45  ;;  %v2119_v50 = vpack.c.bf16 %v459_v48, %v457_v47 }
 0x126   :  { %2068 = vmatprep.subr.bf16.mxu0 %v2067_v53  ;;  %v563_v53 = vld [vmem:[#allocation5 + $0xaf8] sm:$0xf]  ;;  %v1032_v45 = vld [vmem:[#allocation8 + $0x88] sm:$0xff]  ;;  %v1015_v46 = vld [vmem:[#allocation8] sm:$0xff] }
 0x127   :  { %v2223_v61 = vpack.c.bf16 %v563_v53, %v561_v52  ;;  %v458_v52 = vld [vmem:[#allocation5 + $0x7b0] sm:$0xff]  ;;  %v461_v53 = vld [vmem:[#allocation5 + $0x7c8] sm:$0xff] }
 0x128   :  { %794 = vmatmul.mubr.f32.vlgmr.msra.gmra.mrb[0].mxu0 %v156_v0  ;;  %2222 = vmatpush1.bf16.msra.mxu1 %v2221_v59  ;;  %v465_v59 = vld [vmem:[#allocation5 + $0x7e8] sm:$0xff]  ;;  %v466_v0 = vld [vmem:[#allocation5 + $0x7f0] sm:$0xff] }
 0x129   :  { %2070 = vmatpush1.bf16.msra.mxu0 %v2069_v1  ;;  %864 = vmatprep.mubr.f32.mxu0 %v159_v6  ;;  %v2089_v1 = vpack.c.bf16 %v426_v57, %v424_v56  ;;  %v433_v6 = vld [vmem:[#allocation5 + $0x6e8] sm:$0xff]  ;;  %v460_v57 = vld [vmem:[#allocation5 + $0x7c0] sm:$0xff]  ;;  %v2127_v62 = vpack.c.bf16 %v467_v60, %v465_v59  ;;  %v494_v60 = vld [vmem:[#allocation5 + $0x8d0] sm:$0xff] }
 0x12a   :  { %2072 = vmatprep.subr.bf16.mxu0 %v2071_v3  ;;  %v428_v3 = vld [vmem:[#allocation5 + $0x6c0] sm:$0xff]  ;;  %2225 = vmatprep.subr.msk.bf16.mxu1 %vm2900_vm2, %v2223_v61  ;;  %v2095_v9 = vpack.c.bf16 %v435_v7, %v433_v6  ;;  %v2125_v61 = vpack.c.bf16 %v462_v58, %v460_v57  ;;  %v470_v6 = vld [vmem:[#allocation5 + $0x810] sm:$0xff]  ;;  %v473_v7 = vld [vmem:[#allocation5 + $0x828] sm:$0xff] }
 0x12b   :  { %v2093_v8 = vpack.c.bf16 %v430_v4, %v428_v3  ;;  %v2129_v3 = vpack.c.bf16 %v466_v0, %v464_v63  ;;  %v1016_v48 = vld [vmem:[#allocation8 + $0x8] sm:$0xff]  ;;  %v492_v59 = vld [vmem:[#allocation5 + $0x8c0] sm:$0xff]  ;;  %v499_v63 = vld [vmem:[#allocation5 + $0x8f8] sm:$0xff] }
 0x12c   :  { %2228 = vmatpush1.bf16.msk.msra.mxu1 %vm2900_vm2, %v2226_v5  ;;  %v468_v5 = vld [vmem:[#allocation5 + $0x800] sm:$0xff]  ;;  %v1036_v57 = vld [vmem:[#allocation8 + $0xa8] sm:$0xff] }
 0x12d   :  { %2074 = vmatpush1.bf16.msra.mxu0 %v2073_v15  ;;  %v439_v15 = vld [vmem:[#allocation5 + $0x718] sm:$0xff] }
 0x12e   :  { %2076 = vmatprep.subr.bf16.mxu0 %v2075_v17  ;;  %v2099_v17 = vpack.c.bf16 %v439_v15, %v437_v13  ;;  %v161_v13 = vld [vmem:[#allocation2 + $0x48] sm:$0xff]  ;;  %v477_v15 = vld [vmem:[#allocation5 + $0x848] sm:$0xff] }
 0x12f   :  { %1708 = vmatmul.mubr.msk.f32.vlgmr.msra.gmra.mrb[2].mxu1 %vm576_vm3, %v162_v12  ;;  %v474_v12 = vld [vmem:[#allocation5 + $0x830] sm:$0xff] }
 0x131   :  { %2078 = vmatpush1.bf16.msra.mxu0 %v2077_v28  ;;  %v447_v28 = vld [vmem:[#allocation5 + $0x758] sm:$0xff] }
 0x132   :  { %2080 = vmatprep.subr.bf16.mxu0 %v2079_v29  ;;  %v2105_v29 = vpack.c.bf16 %v442_v26, %v440_v25  ;;  %v2107_v30 = vpack.c.bf16 %v447_v28, %v445_v27  ;;  %v480_v26 = vld [vmem:[#allocation5 + $0x860] sm:$0xff]  ;;  %v482_v27 = vld [vmem:[#allocation5 + $0x870] sm:$0xff]  ;;  %v485_v28 = vld [vmem:[#allocation5 + $0x888] sm:$0xff] }
 0x135   :  { %2082 = vmatpush1.bf16.msra.mxu0 %v2081_v41  ;;  %v455_v41 = vld [vmem:[#allocation5 + $0x798] sm:$0xff] }
 0x136   :  { %2084 = vmatprep.subr.bf16.mxu0 %v2083_v42  ;;  %v2113_v42 = vpack.c.bf16 %v450_v38, %v448_v37  ;;  %v2115_v43 = vpack.c.bf16 %v455_v41, %v453_v40  ;;  %v2149_v37 = vpack.c.bf16 %v486_v33, %v484_v32  ;;  %v490_v38 = vld [vmem:[#allocation5 + $0x8b0] sm:$0xff]  ;;  %v493_v40 = vld [vmem:[#allocation5 + $0x8c8] sm:$0xff]  ;;  %v495_v41 = vld [vmem:[#allocation5 + $0x8d8] sm:$0xff] }
 0x137   :  { %v2155_v58 = vpack.c.bf16 %v495_v41, %v493_v40  ;;  %v504_v33 = vld [vmem:[#allocation5 + $0x920] sm:$0xff]  ;;  %v1025_v40 = vld [vmem:[#allocation8 + $0x50] sm:$0xff] }
 0x138   :  { %v1026_v41 = vld [vmem:[#allocation8 + $0x58] sm:$0xff] }
 0x139   :  { %2086 = vmatpush1.bf16.msra.mxu0 %v2085_v54  ;;  %v463_v54 = vld [vmem:[#allocation5 + $0x7d8] sm:$0xff] }
 0x13a   :  { %2088 = vmatprep.subr.bf16.mxu0 %v2087_v55  ;;  %v2121_v55 = vpack.c.bf16 %v458_v52, %v456_v51  ;;  %v2123_v56 = vpack.c.bf16 %v463_v54, %v461_v53  ;;  %v2231_v51 = vpack.c.bf16 %v1016_v48, %v1015_v46  ;;  %v1017_v53 = vld [vmem:[#allocation8 + $0x10] sm:$0xff]  ;;  %v1018_v54 = vld [vmem:[#allocation8 + $0x18] sm:$0xff]  ;;  %v513_v48 = vld [vmem:[#allocation5 + $0x968] sm:$0xff] }
 0x13b   :  { %v510_v46 = vld [vmem:[#allocation5 + $0x950] sm:$0xff] }
 0x13d   :  { %2090 = vmatpush1.bf16.msra.mxu0 %v2089_v1  ;;  %v469_v1 = vld [vmem:[#allocation5 + $0x808] sm:$0xff] }
 0x13e   :  { %2092 = vmatprep.subr.bf16.mxu0 %v2091_v2  ;;  %v471_v2 = vld [vmem:[#allocation5 + $0x818] sm:$0xff] }
 0x13f   :  { %v2131_v4 = vpack.c.bf16 %v471_v2, %v469_v1  ;;  %v1019_v1 = vld [vmem:[#allocation8 + $0x20] sm:$0xff]  ;;  %v1020_v2 = vld [vmem:[#allocation8 + $0x28] sm:$0xff] }
 0x141   :  { %2094 = vmatpush1.bf16.msra.mxu0 %v2093_v8  ;;  %v475_v8 = vld [vmem:[#allocation5 + $0x838] sm:$0xff] }
 0x142   :  { %2096 = vmatprep.subr.bf16.mxu0 %v2095_v9  ;;  %v2133_v9 = vpack.c.bf16 %v470_v6, %v468_v5  ;;  %v2135_v10 = vpack.c.bf16 %v475_v8, %v473_v7  ;;  %v2157_v5 = vpack.c.bf16 %v494_v60, %v492_v59  ;;  %v496_v7 = vld [vmem:[#allocation5 + $0x8e0] sm:$0xff]  ;;  %v498_v8 = vld [vmem:[#allocation5 + $0x8f0] sm:$0xff]  ;;  %v521_v60 = vld [vmem:[#allocation5 + $0x9a8] sm:$0xff] }
 0x143   :  { %v518_v59 = vld [vmem:[#allocation5 + $0x990] sm:$0xff] }
 0x145   :  { %2098 = vmatpush1.bf16.msra.mxu0 %v2097_v16  ;;  %v479_v16 = vld [vmem:[#allocation5 + $0x858] sm:$0xff] }
 0x146   :  { %2100 = vmatprep.subr.bf16.mxu0 %v2099_v17  ;;  %v2137_v17 = vpack.c.bf16 %v474_v12, %v472_v11  ;;  %v2139_v18 = vpack.c.bf16 %v479_v16, %v477_v15  ;;  %v503_v11 = vld [vmem:[#allocation5 + $0x918] sm:$0xff]  ;;  %v1039_v16 = vld [vmem:[#allocation8 + $0xc0] sm:$0xff] }
 0x147   :  { %v1022_v15 = vld [vmem:[#allocation8 + $0x38] sm:$0xff] }
 0x149   :  { %2102 = vmatpush1.bf16.msra.mxu0 %v2101_v23  ;;  %v483_v23 = vld [vmem:[#allocation5 + $0x878] sm:$0xff] }
 0x14a   :  { %2104 = vmatprep.subr.bf16.mxu0 %v2103_v24  ;;  %v2141_v24 = vpack.c.bf16 %v478_v21, %v476_v19  ;;  %v2143_v25 = vpack.c.bf16 %v483_v23, %v481_v22  ;;  %v500_v21 = vld [vmem:[#allocation5 + $0x900] sm:$0xff]  ;;  %v502_v22 = vld [vmem:[#allocation5 + $0x910] sm:$0xff]  ;;  %v505_v23 = vld [vmem:[#allocation5 + $0x928] sm:$0xff] }
 0x14d   :  { %2106 = vmatpush1.bf16.msra.mxu0 %v2105_v29  ;;  %v487_v29 = vld [vmem:[#allocation5 + $0x898] sm:$0xff] }
 0x14e   :  { %2108 = vmatprep.subr.bf16.mxu0 %v2107_v30  ;;  %v2145_v30 = vpack.c.bf16 %v482_v27, %v480_v26  ;;  %v2147_v31 = vpack.c.bf16 %v487_v29, %v485_v28  ;;  %v1023_v27 = vld [vmem:[#allocation8 + $0x40] sm:$0xff]  ;;  %v1024_v28 = vld [vmem:[#allocation8 + $0x48] sm:$0xff]  ;;  %v1041_v29 = vld [vmem:[#allocation8 + $0xd0] sm:$0xff] }
 0x151   :  { %2110 = vmatpush1.bf16.msra.mxu0 %v2109_v35  ;;  %v491_v35 = vld [vmem:[#allocation5 + $0x8b8] sm:$0xff] }
 0x152   :  { %2112 = vmatprep.subr.bf16.mxu0 %v2111_v36  ;;  %v488_v36 = vld [vmem:[#allocation5 + $0x8a0] sm:$0xff] }
 0x155   :  { %2114 = vmatpush1.bf16.msra.mxu0 %v2113_v42  ;;  %v2151_v42 = vpack.c.bf16 %v491_v35, %v489_v34  ;;  %v506_v34 = vld [vmem:[#allocation5 + $0x930] sm:$0xff]  ;;  %v509_v35 = vld [vmem:[#allocation5 + $0x948] sm:$0xff] }
 0x156   :  { %2116 = vmatprep.subr.bf16.mxu0 %v2115_v43  ;;  %v1031_v43 = vld [vmem:[#allocation8 + $0x80] sm:$0xff] }
 0x157   :  { %v2229_v47 = vpack.c.bf16 %v1032_v45, %v1031_v43  ;;  %v508_v45 = vld [vmem:[#allocation5 + $0x940] sm:$0xff] }
 0x159   :  { %2118 = vmatpush1.bf16.msra.mxu0 %v2117_v49  ;;  %v1033_v49 = vld [vmem:[#allocation8 + $0x90] sm:$0xff]  ;;  %2230 = vmatprep.subr.bf16.mxu1 %v2229_v47  ;;  %v2251_v47 = vpack.c.bf16 %v1026_v41, %v1025_v40 }
 0x15a   :  { %2120 = vmatprep.subr.bf16.mxu0 %v2119_v50  ;;  %v1034_v50 = vld [vmem:[#allocation8 + $0x98] sm:$0xff]  ;;  %2232 = vmatpush3.bf16.msra.mxu1 %v2231_v51 }
 0x15b   :  { %v2233_v52 = vpack.c.bf16 %v1034_v50, %v1033_v49  ;;  %v515_v49 = vld [vmem:[#allocation5 + $0x978] sm:$0xff]  ;;  %v2173_v50 = vpack.c.bf16 %v510_v46, %v508_v45 }
 0x15c   :  { %v2175_v51 = vpack.c.bf16 %v515_v49, %v513_v48 }
 0x15d   :  { %2122 = vmatpush1.bf16.msra.mxu0 %v2121_v55  ;;  %v1035_v55 = vld [vmem:[#allocation8 + $0xa0] sm:$0xff]  ;;  %2234 = vmatprep.subr.bf16.mxu1 %v2233_v52 }
 0x15e   :  { %2124 = vmatprep.subr.bf16.mxu0 %v2123_v56  ;;  %v2153_v56 = vpack.c.bf16 %v490_v38, %v488_v36  ;;  %v2237_v0 = vpack.c.bf16 %v1036_v57, %v1035_v55  ;;  %v2247_v36 = vpack.c.bf16 %v1024_v28, %v1023_v27  ;;  %v512_v52 = vld [vmem:[#allocation5 + $0x960] sm:$0xff]  ;;  %v519_v55 = vld [vmem:[#allocation5 + $0x998] sm:$0xff] }
 0x15f   :  { %v1046_v27 = vld [vmem:[#allocation8 + $0xf8] sm:$0xff] }
 0x161   :  { %2126 = vmatpush1.bf16.msra.mxu0 %v2125_v61  ;;  %v497_v61 = vld [vmem:[#allocation5 + $0x8e8] sm:$0xff] }
 0x162   :  { %2128 = vmatprep.subr.bf16.mxu0 %v2127_v62  ;;  %v2235_v62 = vpack.c.bf16 %v1018_v54, %v1017_v53  ;;  %v2159_v6 = vpack.c.bf16 %v499_v63, %v497_v61  ;;  %v514_v53 = vld [vmem:[#allocation5 + $0x970] sm:$0xff]  ;;  %v517_v54 = vld [vmem:[#allocation5 + $0x988] sm:$0xff]  ;;  %v523_v61 = vld [vmem:[#allocation5 + $0x9b8] sm:$0xff] }
 0x163   :  { %v2179_v57 = vpack.c.bf16 %v519_v55, %v517_v54  ;;  %v2183_v63 = vpack.c.bf16 %v523_v61, %v521_v60 }
 0x164   :  { %2236 = vmatpush3.bf16.msra.mxu1 %v2235_v62 }
 0x165   :  { %2130 = vmatpush1.bf16.msra.mxu0 %v2129_v3  ;;  %v1037_v3 = vld [vmem:[#allocation8 + $0xb0] sm:$0xff]  ;;  %2238 = vmatprep.subr.bf16.mxu1 %v2237_v0  ;;  %v520_v0 = vld [vmem:[#allocation5 + $0x9a0] sm:$0xff] }
 0x166   :  { %2132 = vmatprep.subr.bf16.mxu0 %v2131_v4  ;;  %v1038_v4 = vld [vmem:[#allocation8 + $0xb8] sm:$0xff] }
 0x167   :  { %v2241_v12 = vpack.c.bf16 %v1038_v4, %v1037_v3  ;;  %v527_v3 = vld [vmem:[#allocation5 + $0x9d8] sm:$0xff] }
 0x168   :  { %865 = vmatmul.mubr.f32.vlgmr.msra.gmra.mrb[0].mxu0 %v2896_v20 }
 0x169   :  { %2134 = vmatpush1.bf16.msra.mxu0 %v2133_v9  ;;  %935 = vmatprep.mubr.f32.mxu0 %v161_v13  ;;  %v501_v9 = vld [vmem:[#allocation5 + $0x908] sm:$0xff]  ;;  %v1021_v13 = vld [vmem:[#allocation8 + $0x30] sm:$0xff] }
 0x16a   :  { %2136 = vmatprep.subr.bf16.mxu0 %v2135_v10  ;;  %v2239_v10 = vpack.c.bf16 %v1020_v2, %v1019_v1  ;;  %v2163_v19 = vpack.c.bf16 %v503_v11, %v501_v9  ;;  %v522_v1 = vld [vmem:[#allocation5 + $0x9b0] sm:$0xff]  ;;  %v525_v2 = vld [vmem:[#allocation5 + $0x9c8] sm:$0xff]  ;;  %v531_v9 = vld [vmem:[#allocation5 + $0x9f8] sm:$0xff] }
 0x16b   :  { %v2185_v4 = vpack.c.bf16 %v522_v1, %v520_v0 }
 0x16c   :  { %2240 = vmatpush3.bf16.msra.mxu1 %v2239_v10 }
 0x16d   :  { %2138 = vmatpush1.bf16.msra.mxu0 %v2137_v17  ;;  %v1040_v17 = vld [vmem:[#allocation8 + $0xc8] sm:$0xff]  ;;  %2242 = vmatprep.subr.bf16.mxu1 %v2241_v12  ;;  %v528_v12 = vld [vmem:[#allocation5 + $0x9e0] sm:$0xff] }
 0x16e   :  { %2140 = vmatprep.subr.bf16.mxu0 %v2139_v18  ;;  %v2161_v18 = vpack.c.bf16 %v498_v8, %v496_v7  ;;  %v2245_v26 = vpack.c.bf16 %v1040_v17, %v1039_v16  ;;  %v526_v7 = vld [vmem:[#allocation5 + $0x9d0] sm:$0xff]  ;;  %v529_v8 = vld [vmem:[#allocation5 + $0x9e8] sm:$0xff]  ;;  %v176_v39 = vpop.permute.xlu1 %175 }
 0x16f   :  { %v2191_v11 = vpack.c.bf16 %v531_v9, %v529_v8  ;;  %v160_v16 = vld [vmem:[#allocation2 + $0x40] sm:$0xff]  ;;  %v1132_v8 = vld [vmem:[%s3220_s5 + $0x38] sm:$0xff] }
 0x171   :  { %2142 = vmatpush1.bf16.msra.mxu0 %v2141_v24  ;;  %v2243_v24 = vpack.c.bf16 %v1022_v15, %v1021_v13  ;;  %v530_v13 = vld [vmem:[#allocation5 + $0x9f0] sm:$0xff] }
 0x172   :  { %2144 = vmatprep.subr.bf16.mxu0 %v2143_v25  ;;  %v507_v25 = vld [vmem:[#allocation5 + $0x938] sm:$0xff]  ;;  %v2193_v15 = vpack.c.bf16 %v530_v13, %v528_v12  ;;  %v181_v55 = vpop.permute.xlu1 %180 }
 0x173   :  { %v2167_v32 = vpack.c.bf16 %v507_v25, %v505_v23  ;;  %2244 = vmatpush3.bf16.msra.mxu1 %v2243_v24  ;;  %v1027_v23 = vld [vmem:[#allocation8 + $0x60] sm:$0xff]  ;;  %v1028_v24 = vld [vmem:[#allocation8 + $0x68] sm:$0xff]  ;;  %v183_v60 = vsub.f32 %v2896_v20, %v181_v55  ;;  %v1135_v13 = vld [vmem:[%s3220_s5 + $0x50] sm:$0xff] }
 0x174   :  { %2246 = vmatprep.subr.bf16.mxu1 %v2245_v26  ;;  %v2255_v25 = vpack.c.bf16 %v1028_v24, %v1027_v23  ;;  %v1045_v26 = vld [vmem:[#allocation8 + $0xf0] sm:$0xff] }
 0x175   :  { %2146 = vmatpush1.bf16.msra.mxu0 %v2145_v30  ;;  %v1042_v30 = vld [vmem:[#allocation8 + $0xd8] sm:$0xff]  ;;  %v2257_v28 = vpack.c.bf16 %v1046_v27, %v1045_v26  ;;  %v1225_v24 = vld [vmem:[#allocation13 + $0x8] sm:$0xff] }
 0x176   :  { %2148 = vmatprep.subr.bf16.mxu0 %v2147_v31  ;;  %v2165_v31 = vpack.c.bf16 %v502_v22, %v500_v21  ;;  %v2249_v38 = vpack.c.bf16 %v1042_v30, %v1041_v29  ;;  %v1044_v21 = vld [vmem:[#allocation8 + $0xe8] sm:$0xff]  ;;  %v1029_v29 = vld [vmem:[#allocation8 + $0x70] sm:$0xff]  ;;  %v1030_v30 = vld [vmem:[#allocation8 + $0x78] sm:$0xff] }
 0x177   :  { %2248 = vmatpush3.bf16.msra.mxu1 %v2247_v36 }
 0x178   :  { %2250 = vmatprep.subr.bf16.mxu1 %v2249_v38  ;;  %v566_v38 = vlaneseq }
 0x179   :  { %2150 = vmatpush1.bf16.msra.mxu0 %v2149_v37  ;;  %v511_v37 = vld [vmem:[#allocation5 + $0x958] sm:$0xff] }
 0x17a   :  { %2152 = vmatprep.subr.bf16.mxu0 %v2151_v42  ;;  %v2169_v42 = vpack.c.bf16 %v506_v34, %v504_v33  ;;  %v2171_v43 = vpack.c.bf16 %v511_v37, %v509_v35  ;;  %v2697_v34 = vmov 0.0|0.0   ;;  %v2915_v40 = vshrl.u32 %v566_v38, 7  ;;  %v1224_v38 = vld [vmem:[#allocation13] sm:$0xff] }
 0x17b   :  { %2252 = vmatpush3.bf16.msra.mxu1 %v2251_v47  ;;  %v178_v47 = vsub.f32 %v2896_v20, %v176_v39 }
 0x17c   :  { %v568_v41 = vsub.s32 0, %v2915_v40 }
 0x17d   :  { %2154 = vmatpush1.bf16.msra.mxu0 %v2153_v56  ;;  %v2177_v56 = vpack.c.bf16 %v514_v53, %v512_v52 }
 0x17e   :  { %2156 = vmatprep.subr.bf16.mxu0 %v2155_v58  ;;  %v516_v58 = vld [vmem:[#allocation5 + $0x980] sm:$0xff] }
 0x17f   :  { %v2181_v62 = vpack.c.bf16 %v518_v59, %v516_v58  ;;  %v1125_v58 = vld [vmem:[%s3220_s5] sm:$0xff]  ;;  %v1126_v59 = vld [vmem:[%s3220_s5 + $0x8] sm:$0xff] }
 0x180   :  { %v2262_v1 = vpack.c.bf16 %v1126_v59, %v1125_v58  ;;  %v1249_v58 = vld [vmem:[#allocation13 + $0xc8] sm:$0xff] }
 0x181   :  { %2158 = vmatpush1.bf16.msra.mxu0 %v2157_v5  ;;  %v2187_v5 = vpack.c.bf16 %v527_v3, %v525_v2  ;;  %v1127_v3 = vld [vmem:[%s3220_s5 + $0x10] sm:$0xff]  ;;  %v1253_v59 = vld [vmem:[#allocation13 + $0xe8] sm:$0xff] }
 0x182   :  { %2160 = vmatprep.subr.bf16.mxu0 %v2159_v6  ;;  %v524_v6 = vld [vmem:[#allocation5 + $0x9c0] sm:$0xff] }
 0x183   :  { %v2189_v10 = vpack.c.bf16 %v526_v7, %v524_v6  ;;  %v1131_v7 = vld [vmem:[%s3220_s5 + $0x30] sm:$0xff] }
 0x184   :  { %v2271_v9 = vpack.c.bf16 %v1132_v8, %v1131_v7  ;;  %v1235_v7 = vld [vmem:[#allocation13 + $0x58] sm:$0xff] }
 0x185   :  { %2162 = vmatpush1.bf16.msra.mxu0 %v2161_v18  ;;  %v1239_v8 = vld [vmem:[#allocation13 + $0x78] sm:$0xff] }
 0x186   :  { %2164 = vmatprep.subr.bf16.mxu0 %v2163_v19  ;;  %v1043_v19 = vld [vmem:[#allocation8 + $0xe0] sm:$0xff] }
 0x187   :  { %v2253_v22 = vpack.c.bf16 %v1044_v21, %v1043_v19  ;;  %v1139_v21 = vld [vmem:[%s3220_s5 + $0x70] sm:$0xff] }
 0x189   :  { %2166 = vmatpush1.bf16.msra.mxu0 %v2165_v31  ;;  %2254 = vmatprep.subr.bf16.mxu1 %v2253_v22  ;;  %v2259_v31 = vpack.c.bf16 %v1030_v30, %v1029_v29  ;;  %v1140_v22 = vld [vmem:[%s3220_s5 + $0x78] sm:$0xff] }
 0x18a   :  { %2168 = vmatprep.subr.bf16.mxu0 %v2167_v32  ;;  %2256 = vmatpush3.bf16.msra.mxu1 %v2255_v25  ;;  %v165_v32 = vpop.permute.xlu0 %164  ;;  %v2283_v23 = vpack.c.bf16 %v1140_v22, %v1139_v21  ;;  %v1229_v25 = vld [vmem:[#allocation13 + $0x28] sm:$0xff]  ;;  %v1247_v21 = vld [vmem:[#allocation13 + $0xb8] sm:$0xff] }
 0x18b   :  { %2258 = vmatprep.subr.bf16.mxu1 %v2257_v28  ;;  %v167_v33 = vadd.f32 %v165_v32, %v2892_v44  ;;  %v2285_v26 = vpack.c.bf16 %v1229_v25, %v1225_v24  ;;  %v1242_v24 = vld [vmem:[#allocation13 + $0x90] sm:$0xff] }
 0x18c   :  { %v1246_v25 = vld [vmem:[#allocation13 + $0xb0] sm:$0xff] }
 0x18d   :  { %2170 = vmatpush1.bf16.msra.mxu0 %v2169_v42  ;;  %v168_v35 = vmul.f32 0.5, %v167_v33  ;;  %v564_v42 = vld [vmem:[#allocation7] sm:$0x3] }
 0x18e   :  { %2172 = vmatprep.subr.bf16.mxu0 %v2171_v43  ;;  %2260 = vmatpush3.bf16.msra.mxu1 %v2259_v31  ;;  %v572_v43 = vsub.s32 1, %v2915_v40  ;;  %v569_v45 = vrot.slane %v564_v42, %v568_v41 }
 0x18f   :  { %2261 = vmatprep.subr.bf16.mxu1 %v2697_v34  ;;  %170 = vrot.lane.b32.xlu0 %v168_v35, %s2691_s21  ;;  %v1709_v35 = vld [vmem:[#allocation10] ss:$0 sm:$0xff] }
 0x190   :  { %v573_v46 = vrot.slane %v564_v42, %v572_v43  ;;  %v1228_v42 = vld [vmem:[#allocation13 + $0x20] sm:$0xff] }
 0x191   :  { %2174 = vmatpush1.bf16.msra.mxu0 %v2173_v50 }
 0x192   :  { %2176 = vmatprep.subr.bf16.mxu0 %v2175_v51 }
 0x193   :  { %184 = vrot.lane.b32.xlu0 %v2892_v44, %s2698_s16  ;;  %s2705_s16 = smov [#allocation18]  }
 0x195   :  { %2178 = vmatpush1.bf16.msra.mxu0 %v2177_v56 }
 0x196   :  { %2180 = vmatprep.subr.bf16.mxu0 %v2179_v57 }
 0x197   :  { %193 = vrot.lane.b32.xlu0 %v178_v47, %s2699_s17  ;;  %v2287_v47 = vpack.c.bf16 %v1228_v42, %v1224_v38  ;;  %v1464_v38 = vld [vmem:[%s3224_s9 + $0x98] sm:$0xff]  ;;  %v1258_v42 = vld [vmem:[#allocation13 + $0x110] sm:$0x3f]  ;;  %s1689_s17 = sshll.u32 %s2705_s16, 4  ;;  %s1690_s17 = int_to_ptr.vmem [resolvable:$true] %s1689_s17 }
 0x198   :  { %s2620_s6 = scalar_lea.vmem %s1690_s17, 512  ;;  %p2625_p3 = scmp.lt.s32.totalorder %s1690_s17, %s1690_s17 }
 0x199   :  { %2182 = vmatpush1.bf16.msra.mxu0 %v2181_v62  ;;  %p2621_p2 = scmp.ne.s32.totalorder %s1690_s17, %s2620_s6  ;;  %p2626_p4 = scmp.lt.s32.totalorder %s2620_s6, %s2620_s6 }
 0x19a   :  { %2184 = vmatprep.subr.bf16.mxu0 %v2183_v63 }
 0x19b   :  { %p2627_p5 = por %p2626_p4, %p2625_p3 }
 0x19d   :  { %2186 = vmatpush1.bf16.msra.mxu0 %v2185_v4  ;;  %v1128_v4 = vld [vmem:[%s3220_s5 + $0x18] sm:$0xff]  ;;  %p2628_p6 = pnand %p2627_p5, %p2621_p2 }
 0x19e   :  { %2188 = vmatprep.subr.bf16.mxu0 %v2187_v5  ;;  %v2265_v20 = vpack.c.bf16 %v1128_v4, %v1127_v3  ;;  %v1130_v5 = vld [vmem:[%s3220_s5 + $0x28] sm:$0xff]  ;;  %v1231_v3 = vld [vmem:[#allocation13 + $0x38] sm:$0xff]  ;;  %v1256_v4 = vld [vmem:[#allocation13 + $0x100] sm:$0x3f] }
 0x1a1   :  { %2190 = vmatpush1.bf16.msra.mxu0 %v2189_v10  ;;  %v1133_v10 = vld [vmem:[%s3220_s5 + $0x40] sm:$0xff] }
 0x1a2   :  { %2192 = vmatprep.subr.bf16.mxu0 %v2191_v11  ;;  %v1134_v11 = vld [vmem:[%s3220_s5 + $0x48] sm:$0xff] }
 0x1a3   :  { %v2274_v12 = vpack.c.bf16 %v1134_v11, %v1133_v10 }
 0x1a5   :  { %2194 = vmatpush1.bf16.msra.mxu0 %v2193_v15  ;;  %v1136_v15 = vld [vmem:[%s3220_s5 + $0x58] sm:$0xff] }
 0x1a8   :  { %936 = vmatmul.mubr.f32.vlgmr.msra.gmra.mrb[0].mxu0 %v160_v16  ;;  %v2277_v16 = vpack.c.bf16 %v1136_v15, %v1135_v13  ;;  %v2305_v15 = vpack.c.bf16 %v1239_v8, %v1235_v7  ;;  %v1473_v7 = vld [vmem:[%s3224_s9 + $0xe0] sm:$0xff]  ;;  %v1474_v8 = vld [vmem:[%s3224_s9 + $0xe8] sm:$0xff] }
 0x1e2   :  { %v653_v17 = vpop.f32.mrb[0].mxu1 }
 0x1e3   :  { %v655_v18 = vpop.f32.mrb[1].mxu1  ;;  %v654_v48 = vadd.f32 %v653_v17, %v569_v45  ;;  %v1137_v17 = vld [vmem:[%s3220_s5 + $0x60] sm:$0xff] }
 0x1e4   :  { %v656_v49 = vadd.f32 %v655_v18, %v573_v46  ;;  %v1138_v18 = vld [vmem:[%s3220_s5 + $0x68] sm:$0xff] }
 0x1e5   :  { %v2280_v19 = vpack.c.bf16 %v1138_v18, %v1137_v17  ;;  %v1233_v45 = vld [vmem:[#allocation13 + $0x48] sm:$0xff]  ;;  %v1238_v17 = vld [vmem:[#allocation13 + $0x70] sm:$0xff] }
 0x1e6   :  { %v1237_v46 = vld [vmem:[#allocation13 + $0x68] sm:$0xff] }
 0x201   :  { %v171_v51 = vpop.permute.xlu0 %170 }
 0x202   :  { %v1008_v36 = vpop.f32.mrb[2].mxu1  ;;  %v173_v54 = vsub.f32 %v2892_v44, %v171_v51  ;;  %v1236_v51 = vld [vmem:[#allocation13 + $0x60] sm:$0xff] }
 0x203   :  { %v1010_v37 = vpop.f32.mrb[3].mxu1 }
 0x204   :  { %189 = vrot.lane.b32.xlu1 %v173_v54, %s2700_s20 }
 0x205   :  { %v185_v62 = vpop.permute.xlu0 %184 }
 0x206   :  { %v187_v63 = vsub.f32 %v2892_v44, %v185_v62  ;;  %v1129_v44 = vld [vmem:[%s3220_s5 + $0x20] sm:$0xff]  ;;  %s2703_s5 = smov 2  }
 0x207   :  { %v2268_v6 = vpack.c.bf16 %v1130_v5, %v1129_v44  ;;  %v1248_v62 = vld [vmem:[#allocation13 + $0xc0] sm:$0xff]  ;;  %v1710_v44 = vld [vmem:[#allocation11] ss:$0 sm:$0xff]  ;;  %v1226_v5 = vld [vmem:[#allocation13 + $0x10] sm:$0xff] }
 0x208   :  { %197 = vrot.lane.b32.xlu1 %v183_v60, %s2701_s25  ;;  %201 = vrot.lane.b32.xlu0 %v187_v63, %s2694_s10  ;;  %v1252_v63 = vld [vmem:[#allocation13 + $0xe0] sm:$0xff] }
 0x209   :  { %v194_v27 = vpop.permute.xlu0 %193 }
 0x276   :  { %v190_v28 = vpop.permute.xlu1 %189 }
 0x277   :  { %v207_v29 = vsel %vm206_vm5, %v190_v28, %v194_v27  ;;  %v1255_v27 = vld [vmem:[#allocation13 + $0xf8] sm:$0xff]  ;;  %v2311_v28 = vpack.c.bf16 %v1246_v25, %v1242_v24  ;;  %v1260_v25 = vld [vmem:[#allocation14] sm:$0xf] }
 0x27a   :  { %v198_v30 = vpop.permute.xlu1 %197  ;;  %v202_v31 = vpop.permute.xlu0 %201 }
 0x27b   :  { %v937_v50 = vpop.f32.mrb[0].mxu0  ;;  %v209_v32 = vsel %vm208_vm6, %v207_v29, %v198_v30  ;;  %v1250_v30 = vld [vmem:[#allocation13 + $0xd0] sm:$0xff] }
 0x27c   :  { %v2382_v52 = vadd.f32 %v937_v50, %v654_v48  ;;  %v939_v53 = vpop.f32.mrb[1].mxu0  ;;  %v211_v33 = vsel %vm210_vm7, %v209_v32, %v202_v31  ;;  %v1232_v50 = vld [vmem:[#allocation13 + $0x40] sm:$0xff]  ;;  %v1254_v31 = vld [vmem:[#allocation13 + $0xf0] sm:$0xff] }
 0x27d   :  { %v2385_v56 = vadd.f32 %v939_v53, %v656_v49  ;;  %1660 = vrot.lane.b32.xlu0 %v211_v33, %s2703_s5  ;;  %1219 = vrot.lane.b32.xlu1 %v211_v33, %s2704_s3  ;;  %v2289_v49 = vpack.c.bf16 %v1237_v46, %v1233_v45  ;;  %v1245_v53 = vld [vmem:[#allocation13 + $0xa8] sm:$0xff]  ;;  %v2291_v54 = vpack.c.bf16 %v1236_v51, %v1232_v50  ;;  %v1259_v33 = vld [vmem:[#allocation13 + $0x118] sm:$0x3f] }
 0x27e   :  { %v2383_v57 = vadd.f32 %v2382_v52, %v1008_v36  ;;  %v1241_v52 = vld [vmem:[#allocation13 + $0x88] sm:$0xff]  ;;  %v2315_v32 = vpack.c.bf16 %v1254_v31, %v1250_v30 }
 0x27f   :  { %v2386_v61 = vadd.f32 %v2385_v56, %v1010_v37  ;;  %v2293_v55 = vpack.c.bf16 %v1245_v53, %v1241_v52  ;;  %v1240_v56 = vld [vmem:[#allocation13 + $0x80] sm:$0xff]  ;;  %v1466_v50 = vld [vmem:[%s3224_s9 + $0xa8] sm:$0xff] }
 0x280   :  { %v1013_v2 = vmax.f32 %v2383_v57, 0.0  ;;  %v1244_v57 = vld [vmem:[#allocation13 + $0xa0] sm:$0xff] }
 0x281   :  { %v1014_v0 = vmax.f32 %v2386_v61, 0.0  ;;  %v2295_v60 = vpack.c.bf16 %v1244_v57, %v1240_v56  ;;  %v2297_v61 = vpack.c.bf16 %v1253_v59, %v1249_v58  ;;  %v1449_v53 = vld [vmem:[%s3224_s9 + $0x20] sm:$0xff]  ;;  %v1468_v56 = vld [vmem:[%s3224_s9 + $0xb8] sm:$0xff]  ;;  %v1451_v59 = vld [vmem:[%s3224_s9 + $0x30] sm:$0xff] }
 0x282   :  { %v1477_v31 = vld [vmem:[%s3224_s9 + $0x100] sm:$0xff] }
 0x283   :  { %1118 = vmatprep.mubr.f32.mxu1 %v1014_v0  ;;  %v2299_v0 = vpack.c.bf16 %v1252_v63, %v1248_v62  ;;  %v1470_v62 = vld [vmem:[%s3224_s9 + $0xc8] sm:$0xff] }
 0x284   :  { %1119 = vmatmul.mubr.f32.vlgmr.msra.gmra.mrb[4].mxu1 %v1013_v2  ;;  %v1227_v2 = vld [vmem:[#allocation13 + $0x18] sm:$0xff] }
 0x285   :  { %2263 = vmatpush3.bf16.msra.mxu1 %v2262_v1  ;;  %1872 = vmatprep.mubr.msk.f32.mxu1 %vm2702_vm4, %v2693_v14  ;;  %v1257_v1 = vld [vmem:[#allocation13 + $0x108] sm:$0x3f] }
 0x286   :  { %2264 = vmatprep.subr.bf16.mxu1 %v2697_v34 }
 0x289   :  { %2266 = vmatpush3.bf16.msra.mxu1 %v2265_v20  ;;  %v2301_v20 = vpack.c.bf16 %v1231_v3, %v1227_v2  ;;  %v1454_v2 = vld [vmem:[%s3224_s9 + $0x48] sm:$0xff]  ;;  %v1471_v3 = vld [vmem:[%s3224_s9 + $0xd0] sm:$0xff] }
 0x28a   :  { %2267 = vmatprep.subr.bf16.mxu1 %v2697_v34 }
 0x28d   :  { %2269 = vmatpush3.bf16.msra.mxu1 %v2268_v6  ;;  %v1230_v6 = vld [vmem:[#allocation13 + $0x30] sm:$0xff] }
 0x28e   :  { %2270 = vmatprep.subr.bf16.mxu1 %v2697_v34 }
 0x291   :  { %2272 = vmatpush3.bf16.msra.mxu1 %v2271_v9 }
 0x292   :  { %2273 = vmatprep.subr.bf16.mxu1 %v2697_v34 }
 0x295   :  { %2275 = vmatpush3.bf16.msra.mxu1 %v2274_v12  ;;  %v2303_v12 = vpack.c.bf16 %v1230_v6, %v1226_v5  ;;  %v1455_v5 = vld [vmem:[%s3224_s9 + $0x50] sm:$0xff]  ;;  %v1456_v6 = vld [vmem:[%s3224_s9 + $0x58] sm:$0xff] }
 0x296   :  { %2276 = vmatprep.subr.bf16.mxu1 %v2697_v34 }
 0x299   :  { %2278 = vmatpush3.bf16.msra.mxu1 %v2277_v16  ;;  %v1234_v16 = vld [vmem:[#allocation13 + $0x50] sm:$0xff] }
 0x29a   :  { %2279 = vmatprep.subr.bf16.mxu1 %v2697_v34  ;;  %v2307_v22 = vpack.c.bf16 %v1238_v17, %v1234_v16  ;;  %v1476_v16 = vld [vmem:[%s3224_s9 + $0xf8] sm:$0xff] }
 0x29d   :  { %2281 = vmatpush3.bf16.msra.mxu1 %v2280_v19  ;;  %v1243_v19 = vld [vmem:[#allocation13 + $0x98] sm:$0xff] }
 0x29e   :  { %2282 = vmatprep.subr.bf16.mxu1 %v2697_v34 }
 0x2a1   :  { %2284 = vmatpush3.bf16.msra.mxu1 %v2283_v23  ;;  %v2309_v23 = vpack.c.bf16 %v1247_v21, %v1243_v19  ;;  %v1460_v19 = vld [vmem:[%s3224_s9 + $0x78] sm:$0xff] }
 0x2a2   :  { %2286 = vmatprep.subr.bf16.mxu1 %v2285_v26  ;;  %v1251_v26 = vld [vmem:[#allocation13 + $0xd8] sm:$0xff] }
 0x2a3   :  { %v2313_v29 = vpack.c.bf16 %v1255_v27, %v1251_v26  ;;  %v1265_v26 = vrot.slane %v1260_v25, %v568_v41  ;;  %v1269_v27 = vrot.slane %v1260_v25, %v572_v43  ;;  %v1496_v41 = vld [vmem:[%s3224_s9 + $0x198] sm:$0xff] }
 0x2ef   :  { %v1220_v13 = vpop.permute.xlu1 %1219 }
 0x357   :  { %v1750_v34 = vpop.f32.mrb[4].mxu1 }
 0x358   :  { %v1751_v36 = vpop.f32.mrb[5].mxu1 }
 0x359   :  { %v1752_v37 = vadd.f32 %v1751_v36, %v1750_v34  ;;  %v1462_v34 = vld [vmem:[%s3224_s9 + $0x88] sm:$0xff] }
 0x35a   :  { %v1446_v36 = vld [vmem:[%s3224_s9 + $0x8] sm:$0xff] }
 0x35b   :  { %v1121_v39 = vadd.f32 %v1752_v37, %v1709_v35  ;;  %v1445_v35 = vld [vmem:[%s3224_s9] sm:$0xff]  ;;  %v1463_v37 = vld [vmem:[%s3224_s9 + $0x90] sm:$0xff] }
 0x35c   :  { %v2319_v46 = vpack.c.bf16 %v1446_v36, %v1445_v35 }
 0x35d   :  { %v1124_v48 = vmax.f32 %v1121_v39, 0.0  ;;  %v2321_v39 = vpack.c.bf16 %v1464_v38, %v1463_v37  ;;  %v1479_v37 = vld [vmem:[%s3224_s9 + $0x110] sm:$0xff]  ;;  %v1480_v38 = vld [vmem:[%s3224_s9 + $0x118] sm:$0xff] }
 0x35f   :  { %1873 = vmatmul.mubr.f32.vlgmr.msra.gmra.mrb[6].mxu1 %v1124_v48  ;;  %v1448_v48 = vld [vmem:[%s3224_s9 + $0x18] sm:$0xff] }
 0x360   :  { %2288 = vmatpush1.bf16.msra.mxu1 %v2287_v47  ;;  %1363 = vmatprep.mubr.f32.mxu1 %v2693_v14  ;;  %v1447_v47 = vld [vmem:[%s3224_s9 + $0x10] sm:$0xff] }
 0x361   :  { %2290 = vmatprep.subr.bf16.mxu1 %v2289_v49  ;;  %v1465_v49 = vld [vmem:[%s3224_s9 + $0xa0] sm:$0xff]  ;;  %v2323_v51 = vpack.c.bf16 %v1448_v48, %v1447_v47  ;;  %v1482_v48 = vld [vmem:[%s3224_s9 + $0x128] sm:$0xff] }
 0x362   :  { %v2325_v52 = vpack.c.bf16 %v1466_v50, %v1465_v49  ;;  %v1481_v47 = vld [vmem:[%s3224_s9 + $0x120] sm:$0xff]  ;;  %v1499_v49 = vld [vmem:[%s3224_s9 + $0x1b0] sm:$0xff]  ;;  %v1500_v50 = vld [vmem:[%s3224_s9 + $0x1b8] sm:$0xff] }
 0x364   :  { %2292 = vmatpush1.bf16.msra.mxu1 %v2291_v54  ;;  %v1450_v54 = vld [vmem:[%s3224_s9 + $0x28] sm:$0xff] }
 0x365   :  { %2294 = vmatprep.subr.bf16.mxu1 %v2293_v55  ;;  %v1467_v55 = vld [vmem:[%s3224_s9 + $0xb0] sm:$0xff]  ;;  %v2327_v57 = vpack.c.bf16 %v1450_v54, %v1449_v53  ;;  %v1276_v53 = vsub.s32 3, %v2915_v40  ;;  %v2361_v54 = vpack.c.bf16 %v1500_v50, %v1499_v49 }
 0x366   :  { %v2329_v58 = vpack.c.bf16 %v1468_v56, %v1467_v55  ;;  %v1483_v55 = vld [vmem:[%s3224_s9 + $0x130] sm:$0xff]  ;;  %v1484_v56 = vld [vmem:[%s3224_s9 + $0x138] sm:$0xff] }
 0x368   :  { %2296 = vmatpush1.bf16.msra.mxu1 %v2295_v60  ;;  %v1452_v60 = vld [vmem:[%s3224_s9 + $0x38] sm:$0xff] }
 0x369   :  { %2298 = vmatprep.subr.bf16.mxu1 %v2297_v61  ;;  %v1469_v61 = vld [vmem:[%s3224_s9 + $0xc0] sm:$0xff]  ;;  %v2331_v63 = vpack.c.bf16 %v1452_v60, %v1451_v59  ;;  %v2363_v60 = vpack.c.bf16 %v1484_v56, %v1483_v55 }
 0x36c   :  { %2300 = vmatpush1.bf16.msra.mxu1 %v2299_v0  ;;  %v2333_v0 = vpack.c.bf16 %v1470_v62, %v1469_v61  ;;  %v1485_v62 = vld [vmem:[%s3224_s9 + $0x140] sm:$0xff] }
 0x36d   :  { %1711 = vmatprep.subr.msk.mxu1 %vm1286_vm8, %v1257_v1  ;;  %v1453_v1 = vld [vmem:[%s3224_s9 + $0x40] sm:$0xff] }
 0x370   :  { %1712 = vmatpush1.msk.msra.mxu1 %vm1286_vm8, %v1256_v4  ;;  %v1472_v4 = vld [vmem:[%s3224_s9 + $0xd8] sm:$0xff] }
 0x371   :  { %2302 = vmatprep.subr.bf16.mxu1 %v2301_v20  ;;  %v2335_v20 = vpack.c.bf16 %v1454_v2, %v1453_v1  ;;  %v1503_v1 = vld [vmem:[%s3224_s9 + $0x1d0] sm:$0xff]  ;;  %v1504_v2 = vld [vmem:[%s3224_s9 + $0x1d8] sm:$0xff] }
 0x432   :  { %v1214_v9 = vpop.f32.mrb[6].mxu1 }
 0x433   :  { %v1215_v10 = vadd.f32 %v1710_v44, %v1214_v9  ;;  %v1874_v11 = vpop.f32.mrb[7].mxu1  ;;  %v2337_v44 = vpack.c.bf16 %v1472_v4, %v1471_v3  ;;  %v2339_v9 = vpack.c.bf16 %v1456_v6, %v1455_v5  ;;  %v2369_v6 = vpack.c.bf16 %v1504_v2, %v1503_v1 }
 0x434   :  { %v1457_v11 = vld [vmem:[%s3224_s9 + $0x60] sm:$0xff] }
 0x435   :  { %v1223_v18 = vsel %vm1222_vm9, %v1215_v10, %v1220_v13  ;;  %1664 = vrot.lane.b32.xlu1 %v1215_v10, %s2683_s22  ;;  %v2341_v10 = vpack.c.bf16 %v1474_v8, %v1473_v7  ;;  %v1487_v7 = vld [vmem:[%s3224_s9 + $0x150] sm:$0xff]  ;;  %v1488_v8 = vld [vmem:[%s3224_s9 + $0x158] sm:$0xff] }
 0x436   :  { %1713 = vmatmul.mubr.msk.f32.vlgmr.msra.gmra.mrb[8].mxu1 %vm1282_vm10, %v1223_v18 }
 0x437   :  { %2304 = vmatpush1.bf16.msra.mxu1 %v2303_v12  ;;  %1434 = vmatprep.mubr.f32.mxu1 %v2693_v14  ;;  %v1461_v14 = vld [vmem:[%s3224_s9 + $0x80] sm:$0xff]  ;;  %v1458_v12 = vld [vmem:[%s3224_s9 + $0x68] sm:$0xff] }
 0x438   :  { %2306 = vmatprep.subr.bf16.mxu1 %v2305_v15  ;;  %v2317_v45 = vpack.c.bf16 %v1462_v34, %v1461_v14  ;;  %v2343_v13 = vpack.c.bf16 %v1458_v12, %v1457_v11  ;;  %v1475_v15 = vld [vmem:[%s3224_s9 + $0xf0] sm:$0xff]  ;;  %v1506_v11 = vld [vmem:[%s3224_s9 + $0x1e8] sm:$0xff]  ;;  %v2371_v12 = vpack.c.bf16 %v1488_v8, %v1487_v7 }
 0x439   :  { %v2345_v17 = vpack.c.bf16 %v1476_v16, %v1475_v15  ;;  %v1495_v14 = vld [vmem:[%s3224_s9 + $0x190] sm:$0xff]  ;;  %v1489_v15 = vld [vmem:[%s3224_s9 + $0x160] sm:$0xff]  ;;  %v1490_v16 = vld [vmem:[%s3224_s9 + $0x168] sm:$0xff] }
 0x43a   :  { %v2353_v36 = vpack.c.bf16 %v1496_v41, %v1495_v14 }
 0x43b   :  { %2308 = vmatpush1.bf16.msra.mxu1 %v2307_v22  ;;  %v1493_v22 = vld [vmem:[%s3224_s9 + $0x180] sm:$0xff] }
 0x43c   :  { %2310 = vmatprep.subr.bf16.mxu1 %v2309_v23  ;;  %v1494_v23 = vld [vmem:[%s3224_s9 + $0x188] sm:$0xff] }
 0x43d   :  { %v2349_v24 = vpack.c.bf16 %v1494_v23, %v1493_v22  ;;  %v1491_v22 = vld [vmem:[%s3224_s9 + $0x170] sm:$0xff]  ;;  %v1492_v23 = vld [vmem:[%s3224_s9 + $0x178] sm:$0xff] }
 0x43f   :  { %2312 = vmatpush1.bf16.msra.mxu1 %v2311_v28 }
 0x440   :  { %2314 = vmatprep.subr.bf16.mxu1 %v2313_v29 }
 0x443   :  { %2316 = vmatpush1.bf16.msra.mxu1 %v2315_v32  ;;  %v1478_v32 = vld [vmem:[%s3224_s9 + $0x108] sm:$0xff] }
 0x444   :  { %1714 = vmatprep.subr.msk.mxu1 %vm1286_vm8, %v1259_v33  ;;  %v2351_v35 = vpack.c.bf16 %v1478_v32, %v1477_v31 }
 0x447   :  { %1715 = vmatpush1.msk.msra.mxu1 %vm1286_vm8, %v1258_v42  ;;  %v1497_v42 = vld [vmem:[%s3224_s9 + $0x1a0] sm:$0xff] }
 0x448   :  { %1716 = vmatmul.mubr.msk.f32.vlgmr.msra.gmra.mrb[10].mxu1 %vm1282_vm10, %v1223_v18  ;;  %2318 = vmatprep.subr.bf16.mxu1 %v2317_v45  ;;  %v1459_v18 = vld [vmem:[%s3224_s9 + $0x70] sm:$0xff]  ;;  %v1498_v45 = vld [vmem:[%s3224_s9 + $0x1a8] sm:$0xff] }
 0x449   :  { %2320 = vmatpush3.bf16.msra.mxu1 %v2319_v46  ;;  %v2347_v21 = vpack.c.bf16 %v1460_v19, %v1459_v18  ;;  %v2355_v46 = vpack.c.bf16 %v1480_v38, %v1479_v37  ;;  %v1508_v18 = vld [vmem:[%s3224_s9 + $0x1f8] sm:$0xff]  ;;  %v2375_v19 = vpack.c.bf16 %v1490_v16, %v1489_v15 }
 0x44a   :  { %2322 = vmatprep.subr.bf16.mxu1 %v2321_v39  ;;  %v2357_v39 = vpack.c.bf16 %v1498_v45, %v1497_v42 }
 0x44d   :  { %2324 = vmatpush3.bf16.msra.mxu1 %v2323_v51  ;;  %v1272_v51 = vsub.s32 2, %v2915_v40  ;;  %v1277_v40 = vrot.slane %v1260_v25, %v1276_v53 }
 0x44e   :  { %2326 = vmatprep.subr.bf16.mxu1 %v2325_v52  ;;  %v2359_v52 = vpack.c.bf16 %v1482_v48, %v1481_v47 }
 0x44f   :  { %v1273_v59 = vrot.slane %v1260_v25, %v1272_v51 }
 0x451   :  { %2328 = vmatpush3.bf16.msra.mxu1 %v2327_v57  ;;  %v1501_v57 = vld [vmem:[%s3224_s9 + $0x1c0] sm:$0xff] }
 0x452   :  { %2330 = vmatprep.subr.bf16.mxu1 %v2329_v58  ;;  %v1502_v58 = vld [vmem:[%s3224_s9 + $0x1c8] sm:$0xff] }
 0x453   :  { %v2365_v61 = vpack.c.bf16 %v1502_v58, %v1501_v57 }
 0x455   :  { %2332 = vmatpush3.bf16.msra.mxu1 %v2331_v63  ;;  %v1486_v63 = vld [vmem:[%s3224_s9 + $0x148] sm:$0xff] }
 0x456   :  { %2334 = vmatprep.subr.bf16.mxu1 %v2333_v0 }
 0x459   :  { %2336 = vmatpush3.bf16.msra.mxu1 %v2335_v20 }
 0x45a   :  { %2338 = vmatprep.subr.bf16.mxu1 %v2337_v44  ;;  %v2367_v44 = vpack.c.bf16 %v1486_v63, %v1485_v62 }
 0x45d   :  { %2340 = vmatpush3.bf16.msra.mxu1 %v2339_v9 }
 0x45e   :  { %2342 = vmatprep.subr.bf16.mxu1 %v2341_v10  ;;  %v1505_v10 = vld [vmem:[%s3224_s9 + $0x1e0] sm:$0xff] }
 0x461   :  { %2344 = vmatpush3.bf16.msra.mxu1 %v2343_v13  ;;  %v2373_v13 = vpack.c.bf16 %v1506_v11, %v1505_v10 }
 0x462   :  { %2346 = vmatprep.subr.bf16.mxu1 %v2345_v17  ;;  %v1507_v17 = vld [vmem:[%s3224_s9 + $0x1f0] sm:$0xff] }
 0x465   :  { %2348 = vmatpush3.bf16.msra.mxu1 %v2347_v21  ;;  %v2377_v21 = vpack.c.bf16 %v1508_v18, %v1507_v17 }
 0x466   :  { %2350 = vmatprep.subr.bf16.mxu1 %v2349_v24  ;;  %v2379_v24 = vpack.c.bf16 %v1492_v23, %v1491_v22 }
 0x509   :  { %v1365_v28 = vpop.f32.mrb[8].mxu1 }
 0x50a   :  { %v1366_v29 = vadd.f32 %v1365_v28, %v1265_v26  ;;  %v1367_v30 = vpop.f32.mrb[9].mxu1 }
 0x50b   :  { %v1368_v33 = vadd.f32 %v1367_v30, %v1269_v27 }
 0x50c   :  { %v1441_v43 = vmax.f32 %v1366_v29, 0.0 }
 0x50d   :  { %v1442_v34 = vmax.f32 %v1368_v33, 0.0 }
 0x50e   :  { %1656 = vst [vmem:[#allocation18] sm:$0xff] %v1441_v43 }
 0x50f   :  { %1657 = vst [vmem:[#allocation18 + $0x8] sm:$0xff] %v1442_v34  ;;  %1580 = vmatprep.mubr.f32.mxu1 %v1442_v34 }
 0x510   :  { %1581 = vmatmul.mubr.f32.vlgmr.msra.gmra.mrb[12].mxu1 %v1441_v43 }
 0x511   :  { %2352 = vmatpush3.bf16.msra.mxu1 %v2351_v35 }
 0x512   :  { %2354 = vmatprep.subr.bf16.mxu1 %v2353_v36 }
 0x515   :  { %2356 = vmatpush3.bf16.msra.mxu1 %v2355_v46 }
 0x516   :  { %2358 = vmatprep.subr.bf16.mxu1 %v2357_v39 }
 0x519   :  { %2360 = vmatpush3.bf16.msra.mxu1 %v2359_v52 }
 0x51a   :  { %2362 = vmatprep.subr.bf16.mxu1 %v2361_v54 }
 0x51b   :  { %v1436_v0 = vpop.f32.mrb[10].mxu1 }
 0x51c   :  { %v1437_v3 = vadd.f32 %v1436_v0, %v1273_v59  ;;  %v1438_v4 = vpop.f32.mrb[11].mxu1 }
 0x51d   :  { %v1439_v20 = vadd.f32 %v1438_v4, %v1277_v40  ;;  %2364 = vmatpush3.bf16.msra.mxu1 %v2363_v60 }
 0x51e   :  { %v1443_v5 = vmax.f32 %v1437_v3, 0.0  ;;  %2366 = vmatprep.subr.bf16.mxu1 %v2365_v61 }
 0x51f   :  { %v1444_v9 = vmax.f32 %v1439_v20, 0.0 }
 0x520   :  { %1658 = vst [vmem:[#allocation18 + $0x10] sm:$0xff] %v1443_v5 }
 0x521   :  { %1659 = vst [vmem:[#allocation18 + $0x18] sm:$0xff] %v1444_v9  ;;  %2368 = vmatpush3.bf16.msra.mxu1 %v2367_v44  ;;  %1650 = vmatprep.mubr.f32.mxu1 %v1444_v9 }
 0x522   :  { %2370 = vmatprep.subr.bf16.mxu1 %v2369_v6 }
 0x525   :  { %2372 = vmatpush3.bf16.msra.mxu1 %v2371_v12 }
 0x526   :  { %2374 = vmatprep.subr.bf16.mxu1 %v2373_v13 }
 0x529   :  { %2376 = vmatpush3.bf16.msra.mxu1 %v2375_v19 }
 0x52a   :  { %2378 = vmatprep.subr.bf16.mxu1 %v2377_v21 }
 0x52d   :  { %2380 = vmatpush3.bf16.msra.mxu1 %v2379_v24 }
 0x530   :  { %1651 = vmatmul.mubr.f32.vlgmr.msra.gmra.mrb[14].mxu1 %v1443_v5 }
 0x531   :  { %2631 = shalt.err (!%p2628_p6)
}
 0x532   :  { %s2632_s0 = scalar_lea.hbm %s3227_s12, 512 }
 0x533   :  { %p2633_p7 = scmp.ne.s32.totalorder %s3227_s12, %s2632_s0  ;;  %p2636_p8 = scmp.lt.u32.totalorder %s2632_s0, %s3227_s12 }
 0x535   :  { %p2638_p9 = pnand %p2636_p8, %p2633_p7 }
 0x537   :  { %2641 = shalt.err (!%p2638_p9)
}
 0x538   :  { %1692 = dma.vmem_to_hbm [thread:$0]  %s1690_s17, 512, %s3227_s12, [#allocation19]   ;;  %v1717_v28 = vld [vmem:[#allocation16] ss:$0 sm:$0xff]  ;;  %vm204_vm11 = vcmask 15360   ;;  %vm1668_vm12 = vcmask 64512   ;;  %v1661_v14 = vpop.permute.xlu0 %1660  ;;  %v1665_v41 = vpop.permute.xlu1 %1664 }
 0x539   :  { %s2706_s3 = smov [#allocation17]   ;;  %vm1670_vm13 = vcmask 588800  }
 0x53a   :  { %s1679_s22 = sshll.u32 %s2706_s3, 4  ;;  %s1680_s22 = int_to_ptr.vmem [resolvable:$true] %s1679_s22 }
 0x53b   :  { %s2642_s12 = scalar_lea.vmem %s1680_s22, 128  ;;  %p2647_p11 = scmp.lt.s32.totalorder %s1680_s22, %s1680_s22 }
 0x53c   :  { %p2643_p10 = scmp.ne.s32.totalorder %s1680_s22, %s2642_s12  ;;  %p2648_p12 = scmp.lt.s32.totalorder %s2642_s12, %s2642_s12 }
 0x53e   :  { %p2649_p13 = por %p2648_p12, %p2647_p11 }
 0x540   :  { %p2650_p0 = pnand %p2649_p13, %p2643_p10 }
 0x5e3   :  { %v1802_v25 = vpop.f32.mrb[12].mxu1 }
 0x5e4   :  { %v1803_v26 = vpop.f32.mrb[13].mxu1 }
 0x5e5   :  { %v1804_v27 = vadd.f32 %v1803_v26, %v1802_v25 }
 0x5e7   :  { %v1583_v31 = vadd.f32 %v1804_v27, %v1717_v28 }
 0x603   :  { %v1837_v29 = vpop.f32.mrb[14].mxu1 }
 0x604   :  { %v1838_v30 = vpop.f32.mrb[15].mxu1 }
 0x605   :  { %v1839_v32 = vadd.f32 %v1838_v30, %v1837_v29 }
 0x607   :  { %v1653_v33 = vadd.f32 %v1839_v32, %v1583_v31 }
 0x609   :  { %v1667_v43 = vsel %vm204_vm11, %v1653_v33, %v1661_v14 }
 0x60a   :  { %v1669_v34 = vsel %vm1668_vm12, %v1667_v43, %v1665_v41 }
 0x60b   :  { %v1671_v35 = vsel %vm1670_vm13, %v1669_v34, 0.0 }
 0x60c   :  { %1672 = vst [vmem:[#allocation17] sm:$0xff] %v1671_v35 }
 0x60d   :  { %2653 = shalt.err (!%p2650_p0)
}
 0x60e   :  { %s2654_s27 = scalar_lea.hbm %s3226_s11, 128 }
 0x60f   :  { %p2655_p1 = scmp.ne.s32.totalorder %s3226_s11, %s2654_s27  ;;  %p2658_p2 = scmp.lt.u32.totalorder %s2654_s27, %s3226_s11 }
 0x611   :  { %p2660_p3 = pnand %p2658_p2, %p2655_p1 }
 0x613   :  { %2663 = shalt.err (!%p2660_p3)
}
 0x614   :  { %1682 = dma.vmem_to_hbm [thread:$0]  %s1680_s22, 128, %s3226_s11, [#allocation4]  }
 0x615   :  { %2674 = dma.done.wait [#allocation4], 128  }
 0x616   :  { %2675 = vsyncadd [#allocation4], 4294967168 }
 0x617   :  { %2676 = dma.done.wait [#allocation19], 512  }
 0x618   :  { %2677 = vsyncadd [#allocation19], 4294966784 }
 0x619   :  { %1699 = vsyncpa [#allocation3], 1 }
 0x61a   :  { %1700 = vsyncpa [#allocation6], 1 }
 0x61b   :  { %1701 = vsyncpa [#allocation9], 1 }
 0x61c   :  { %1702 = vsyncpa [#allocation12], 1 }
 0x61d   :  { %1703 = vsyncpa [#allocation15], 1 }
 0x61e   :  { %1704 = vsyncpa [#allocation4], 1 }
 0x61f   :  { %1705 = vsyncpa [#allocation19], 1 }

</bundles_post_ra>
